<compile_context>
chip_gen: v6e
topology: v6e:2x2x1
jax: 0.10.0
libtpu: 0.0.40
codegen_flags: <defaults>
</compile_context>

<pallas_src>
import functools

import jax
import jax.numpy as jnp
from jax import lax
from jax.experimental import pallas as pl
from jax.experimental.pallas import tpu as pltpu


# dot_general dimension numbers for A (M, K) x B (N, K)^T -> (M, N) ("NT" matmul).
_NT_DIMS = (((1,), (1,)), ((), ()))


def _round_up(v, m):
    return ((v + m - 1) // m) * m


def _pick_act_dtype():
    """bf16 activations on chips with a bf16 VALU (v6e/v7x); f32 on v5e-class/older."""
    try:
        kind = jax.devices()[0].device_kind.lower()
    except Exception:
        return jnp.bfloat16
    for tag in ("v5 lite", "v5e", "v5lite", "v4", "v3", "v2"):
        if tag in kind:
            return jnp.float32
    return jnp.bfloat16


def mlp_kernel(x_ref,
               w1_ref, b1_ref,
               w2_ref, b2_ref,
               w3_ref, b3_ref,
               w4_ref, b4_ref,
               w5_ref, b5_ref,
               o_ref, *, act_dtype):
    # Hidden layer: bf16 MXU dot with f32 accumulation, then bias-add + ReLU in
    # act_dtype (bf16 on v6e/v7x, f32 on v5e), re-cast to bf16 for the next dot.
    def hidden(h_bf16, w_ref, b_ref):
        acc = jnp.dot(h_bf16, w_ref[...], preferred_element_type=jnp.float32)
        act = jnp.maximum(acc.astype(act_dtype) + b_ref[...], 0)
        return act.astype(jnp.bfloat16)

    h = x_ref[...].astype(jnp.bfloat16)   # f32 -> bf16 on the VPU, hidden under the MXU
    h = hidden(h, w1_ref, b1_ref)
    h = hidden(h, w2_ref, b2_ref)
    h = hidden(h, w3_ref, b3_ref)
    h = hidden(h, w4_ref, b4_ref)

    # Final 32 -> 1 layer in NT form: (8, 32) x (TB, 32)^T -> (8, TB).
    # Row 0 of w5_ref holds w5^T (rows 1..7 are zero), so row 0 of `out` is the
    # real output, laid out lane-dense along the batch tile (unmasked vst).
    out = lax.dot_general(w5_ref[...], h, _NT_DIMS,
                          preferred_element_type=jnp.float32)
    o_ref[...] = out + b5_ref[0]


def super_complex_model(x, params, *, tb=None, act_dtype=None):
    """x: (B, F) float32. params: list of (W, b) with W (in, out), b (1, out)."""
    B, F = x.shape

    if act_dtype is None:
        act_dtype = _pick_act_dtype()
    if tb is None:
        # v5e-class: smaller tile + f32 VPU math (single vst slot, no bf16 VALU);
        # v6e/v7x: tall tiles amortize per-grid-step overhead and MXU weight pushes.
        tb = 512 if act_dtype == jnp.float32 else 1024

    # Batch tile: multiple of 128 lanes (lane-dense output), clamped so there are
    # >=2 tiles whenever the batch allows it (keeps both v7x TensorCores busy).
    TB = max(128, min(tb, _round_up(pl.cdiv(B, 2), 128)))
    n_tiles = pl.cdiv(B, TB)
    B_pad = n_tiles * TB
    if B_pad != B:
        # TODO(synk): ragged last tile could be handled with in-kernel row masking
        # instead of this (rarely hit) host-side pad.
        x = jnp.pad(x, ((0, B_pad - B), (0, 0)))

    (w1, b1), (w2, b2), (w3, b3), (w4, b4), (w5, b5) = params
    hidden_ws = [w.astype(jnp.bfloat16) for w in (w1, w2, w3, w4)]
    hidden_bs = [b.astype(act_dtype) for b in (b1, b2, b3, b4)]
    # Final layer stored as an (8, 32) row block: row 0 = w5^T, rows 1..7 zero.
    w5_blk = jnp.pad(w5.T, ((0, 7), (0, 0))).astype(jnp.bfloat16)
    b5_s = b5.reshape(-1).astype(jnp.float32)        # (1,) scalar, lives in SMEM

    flat = [x]
    in_specs = [pl.BlockSpec((TB, F), lambda i: (i, 0))]
    for w, b in zip(hidden_ws, hidden_bs):
        flat += [w, b]
        # Grid-invariant blocks: same block index every batch tile, so the
        # weights/biases are DMA'd once and stay VMEM-resident.
        in_specs += [pl.BlockSpec(w.shape, lambda i: (0, 0)),
                     pl.BlockSpec(b.shape, lambda i: (0, 0))]
    flat += [w5_blk, b5_s]
    in_specs += [pl.BlockSpec(w5_blk.shape, lambda i: (0, 0)),
                 pl.BlockSpec(memory_space=pltpu.MemorySpace.SMEM)]

    flops = 2 * B_pad * (sum(w.shape[0] * w.shape[1] for w in hidden_ws)
                         + w5_blk.shape[0] * w5_blk.shape[1])
    bytes_accessed = (x.size * x.dtype.itemsize
                      + sum(w.size * 2 for w in hidden_ws) + w5_blk.size * 2
                      + sum(b.size * b.dtype.itemsize for b in hidden_bs) + 4
                      + 8 * B_pad * 4)

    out = pl.pallas_call(
        functools.partial(mlp_kernel, act_dtype=act_dtype),
        out_shape=jax.ShapeDtypeStruct((8, B_pad), jnp.float32),
        grid=(n_tiles,),
        in_specs=in_specs,
        out_specs=pl.BlockSpec((8, TB), lambda i: (0, i)),
        compiler_params=pltpu.CompilerParams(
            # Shard batch tiles across both v7x TensorCores; no-op on v5e/v6e.
            dimension_semantics=("parallel",),
        ),
        cost_estimate=pl.CostEstimate(flops=flops, transcendentals=0,
                                      bytes_accessed=bytes_accessed),
    )(*flat)

    # Row 0 of the lane-dense (8, B_pad) result is the real model output.
    return out[0, :B].reshape(B, 1)


def init_params(key, input_features):
    """Deterministic init matching the nn.Linear layer shapes of the module."""
    dims = [input_features, 64, 128, 64, 32, 1]
    params = []
    for i in range(len(dims) - 1):
        fan_in, fan_out = dims[i], dims[i + 1]
        key, wk, bk = jax.random.split(key, 3)
        bound = 1.0 / jnp.sqrt(fan_in)
        # Stored as (in, out) -- transpose of PyTorch's (out, in) weight layout.
        w = jax.random.uniform(wk, (fan_in, fan_out), jnp.float32, -bound, bound)
        b = jax.random.uniform(bk, (1, fan_out), jnp.float32, -bound, bound)
        params.append((w, b))
    return params


def reference_forward(x, params):
    h = x
    for i, (w, b) in enumerate(params):
        h = h @ w + b
        if i < len(params) - 1:
            h = jnp.maximum(h, 0.0)
    return h


if __name__ == "__main__":
    key = jax.random.PRNGKey(0)
    B, F = 1024, 32                      # -> 2 batch tiles of 512 rows, no padding
    key, xk = jax.random.split(key)
    x = jax.random.normal(xk, (B, F), jnp.float32)
    params = init_params(key, F)

    run = jax.jit(super_complex_model)
    out = jax.block_until_ready(run(x, params))

    ref = reference_forward(x, params)
    assert out.shape == (B, 1), out.shape
    # bf16 MXU operands with f32 accumulation: relax tolerance vs. pure-f32 ref.
    assert jnp.allclose(out, ref, atol=5e-2, rtol=5e-2), (
        float(jnp.max(jnp.abs(out - ref))))
    print("KERNEL_OK")
</pallas_src>

<mosaic_0001>
module attributes {stable_mosaic.version = 11 : i64} {
  func.func @mlp_kernel(%arg0: i32, %arg1: memref<512x32xf32, #tpu.memory_space<vmem>>, %arg2: memref<32x64xbf16, #tpu.memory_space<vmem>>, %arg3: memref<1x64xbf16, #tpu.memory_space<vmem>>, %arg4: memref<64x128xbf16, #tpu.memory_space<vmem>>, %arg5: memref<1x128xbf16, #tpu.memory_space<vmem>>, %arg6: memref<128x64xbf16, #tpu.memory_space<vmem>>, %arg7: memref<1x64xbf16, #tpu.memory_space<vmem>>, %arg8: memref<64x32xbf16, #tpu.memory_space<vmem>>, %arg9: memref<1x32xbf16, #tpu.memory_space<vmem>>, %arg10: memref<8x32xbf16, #tpu.memory_space<vmem>>, %arg11: memref<1xf32, #tpu.memory_space<smem>>, %arg12: memref<8x512xf32, #tpu.memory_space<vmem>>) attributes {dimension_semantics = [#tpu.dimension_semantics<parallel>], iteration_bounds = array<i64: 2>, scalar_prefetch = 0 : i64, scratch_operands = 0 : i64, tpu.core_type = #tpu.core_type<tc>, window_params = [{transform_indices = @transform_0, window_bounds = array<i64: 512, 32>}, {pipeline_mode = #tpu.pipeline_mode<synchronous>, transform_indices = @transform_1, window_bounds = array<i64: 32, 64>}, {pipeline_mode = #tpu.pipeline_mode<synchronous>, transform_indices = @transform_2, window_bounds = array<i64: 1, 64>}, {pipeline_mode = #tpu.pipeline_mode<synchronous>, transform_indices = @transform_3, window_bounds = array<i64: 64, 128>}, {pipeline_mode = #tpu.pipeline_mode<synchronous>, transform_indices = @transform_4, window_bounds = array<i64: 1, 128>}, {pipeline_mode = #tpu.pipeline_mode<synchronous>, transform_indices = @transform_5, window_bounds = array<i64: 128, 64>}, {pipeline_mode = #tpu.pipeline_mode<synchronous>, transform_indices = @transform_6, window_bounds = array<i64: 1, 64>}, {pipeline_mode = #tpu.pipeline_mode<synchronous>, transform_indices = @transform_7, window_bounds = array<i64: 64, 32>}, {pipeline_mode = #tpu.pipeline_mode<synchronous>, transform_indices = @transform_8, window_bounds = array<i64: 1, 32>}, {pipeline_mode = #tpu.pipeline_mode<synchronous>, transform_indices = @transform_9, window_bounds = array<i64: 8, 32>}, {transform_indices = @transform_10, window_bounds = array<i64: 1>}, {transform_indices = @transform_11, window_bounds = array<i64: 8, 512>}]} {
    %c0 = arith.constant 0 : index
    %c0_0 = arith.constant 0 : index
    %0 = vector.load %arg1[%c0, %c0_0] : memref<512x32xf32, #tpu.memory_space<vmem>>, vector<512x32xf32>
    %1 = arith.truncf %0 : vector<512x32xf32> to vector<512x32xbf16>
    %c0_1 = arith.constant 0 : index
    %c0_2 = arith.constant 0 : index
    %2 = vector.load %arg2[%c0_1, %c0_2] : memref<32x64xbf16, #tpu.memory_space<vmem>>, vector<32x64xbf16>
    %cst = arith.constant dense<0.000000e+00> : vector<512x64xf32>
    %3 = tpu.matmul %1, %2, %cst {dimension_numbers = #tpu.dot_dimension_numbers<[1], [0], [0], [1], [0, 0, 1, 1], [], []>} : vector<512x32xbf16>, vector<32x64xbf16>, vector<512x64xf32> -> vector<512x64xf32>
    %4 = arith.truncf %3 : vector<512x64xf32> to vector<512x64xbf16>
    %c0_3 = arith.constant 0 : index
    %c0_4 = arith.constant 0 : index
    %5 = vector.load %arg3[%c0_3, %c0_4] : memref<1x64xbf16, #tpu.memory_space<vmem>>, vector<1x64xbf16>
    %6 = vector.broadcast %5 : vector<1x64xbf16> to vector<512x64xbf16>
    %7 = arith.addf %4, %6 : vector<512x64xbf16>
    %cst_5 = arith.constant 0.000000e+00 : bf16
    %8 = vector.broadcast %cst_5 : bf16 to vector<512x64xbf16>
    %9 = arith.maximumf %7, %8 : vector<512x64xbf16>
    %c0_6 = arith.constant 0 : index
    %c0_7 = arith.constant 0 : index
    %10 = vector.load %arg4[%c0_6, %c0_7] : memref<64x128xbf16, #tpu.memory_space<vmem>>, vector<64x128xbf16>
    %cst_8 = arith.constant dense<0.000000e+00> : vector<512x128xf32>
    %11 = tpu.matmul %9, %10, %cst_8 {dimension_numbers = #tpu.dot_dimension_numbers<[1], [0], [0], [1], [0, 0, 1, 1], [], []>} : vector<512x64xbf16>, vector<64x128xbf16>, vector<512x128xf32> -> vector<512x128xf32>
    %12 = arith.truncf %11 : vector<512x128xf32> to vector<512x128xbf16>
    %c0_9 = arith.constant 0 : index
    %c0_10 = arith.constant 0 : index
    %13 = vector.load %arg5[%c0_9, %c0_10] : memref<1x128xbf16, #tpu.memory_space<vmem>>, vector<1x128xbf16>
    %14 = vector.broadcast %13 : vector<1x128xbf16> to vector<512x128xbf16>
    %15 = arith.addf %12, %14 : vector<512x128xbf16>
    %cst_11 = arith.constant 0.000000e+00 : bf16
    %16 = vector.broadcast %cst_11 : bf16 to vector<512x128xbf16>
    %17 = arith.maximumf %15, %16 : vector<512x128xbf16>
    %c0_12 = arith.constant 0 : index
    %c0_13 = arith.constant 0 : index
    %18 = vector.load %arg6[%c0_12, %c0_13] : memref<128x64xbf16, #tpu.memory_space<vmem>>, vector<128x64xbf16>
    %cst_14 = arith.constant dense<0.000000e+00> : vector<512x64xf32>
    %19 = tpu.matmul %17, %18, %cst_14 {dimension_numbers = #tpu.dot_dimension_numbers<[1], [0], [0], [1], [0, 0, 1, 1], [], []>} : vector<512x128xbf16>, vector<128x64xbf16>, vector<512x64xf32> -> vector<512x64xf32>
    %20 = arith.truncf %19 : vector<512x64xf32> to vector<512x64xbf16>
    %c0_15 = arith.constant 0 : index
    %c0_16 = arith.constant 0 : index
    %21 = vector.load %arg7[%c0_15, %c0_16] : memref<1x64xbf16, #tpu.memory_space<vmem>>, vector<1x64xbf16>
    %22 = vector.broadcast %21 : vector<1x64xbf16> to vector<512x64xbf16>
    %23 = arith.addf %20, %22 : vector<512x64xbf16>
    %cst_17 = arith.constant 0.000000e+00 : bf16
    %24 = vector.broadcast %cst_17 : bf16 to vector<512x64xbf16>
    %25 = arith.maximumf %23, %24 : vector<512x64xbf16>
    %c0_18 = arith.constant 0 : index
    %c0_19 = arith.constant 0 : index
    %26 = vector.load %arg8[%c0_18, %c0_19] : memref<64x32xbf16, #tpu.memory_space<vmem>>, vector<64x32xbf16>
    %cst_20 = arith.constant dense<0.000000e+00> : vector<512x32xf32>
    %27 = tpu.matmul %25, %26, %cst_20 {dimension_numbers = #tpu.dot_dimension_numbers<[1], [0], [0], [1], [0, 0, 1, 1], [], []>} : vector<512x64xbf16>, vector<64x32xbf16>, vector<512x32xf32> -> vector<512x32xf32>
    %28 = arith.truncf %27 : vector<512x32xf32> to vector<512x32xbf16>
    %c0_21 = arith.constant 0 : index
    %c0_22 = arith.constant 0 : index
    %29 = vector.load %arg9[%c0_21, %c0_22] : memref<1x32xbf16, #tpu.memory_space<vmem>>, vector<1x32xbf16>
    %30 = vector.broadcast %29 : vector<1x32xbf16> to vector<512x32xbf16>
    %31 = arith.addf %28, %30 : vector<512x32xbf16>
    %cst_23 = arith.constant 0.000000e+00 : bf16
    %32 = vector.broadcast %cst_23 : bf16 to vector<512x32xbf16>
    %33 = arith.maximumf %31, %32 : vector<512x32xbf16>
    %c0_24 = arith.constant 0 : index
    %c0_25 = arith.constant 0 : index
    %34 = vector.load %arg10[%c0_24, %c0_25] : memref<8x32xbf16, #tpu.memory_space<vmem>>, vector<8x32xbf16>
    %cst_26 = arith.constant dense<0.000000e+00> : vector<8x512xf32>
    %35 = tpu.matmul %34, %33, %cst_26 {dimension_numbers = #tpu.dot_dimension_numbers<[1], [1], [0], [0], [0, 0, 1, 0], [], []>} : vector<8x32xbf16>, vector<512x32xbf16>, vector<8x512xf32> -> vector<8x512xf32>
    %c0_27 = arith.constant 0 : index
    %36 = memref.load %arg11[%c0_27] : memref<1xf32, #tpu.memory_space<smem>>
    %37 = vector.broadcast %36 : f32 to vector<8x512xf32>
    %38 = arith.addf %35, %37 : vector<8x512xf32>
    %c0_28 = arith.constant 0 : index
    %c0_29 = arith.constant 0 : index
    %39 = vector.load %arg12[%c0_28, %c0_29] : memref<8x512xf32, #tpu.memory_space<vmem>>, vector<8x512xf32>
    tpu.vector_store %arg12[%c0_28, %c0_29], %38 {strides = array<i32>} : memref<8x512xf32, #tpu.memory_space<vmem>>, vector<8x512xf32>,
    return
  }
  func.func @transform_0(%arg0: i32) -> (i32, i32) {
    %c0_i32 = arith.constant 0 : i32
    %c0_i32_0 = arith.constant 0 : i32
    return %arg0, %c0_i32 : i32, i32
  }
  func.func @transform_1(%arg0: i32) -> (i32, i32) {
    %c0_i32 = arith.constant 0 : i32
    %c0_i32_0 = arith.constant 0 : i32
    %c0_i32_1 = arith.constant 0 : i32
    return %c0_i32, %c0_i32_0 : i32, i32
  }
  func.func @transform_2(%arg0: i32) -> (i32, i32) {
    %c0_i32 = arith.constant 0 : i32
    %c0_i32_0 = arith.constant 0 : i32
    %c0_i32_1 = arith.constant 0 : i32
    return %c0_i32, %c0_i32_0 : i32, i32
  }
  func.func @transform_3(%arg0: i32) -> (i32, i32) {
    %c0_i32 = arith.constant 0 : i32
    %c0_i32_0 = arith.constant 0 : i32
    %c0_i32_1 = arith.constant 0 : i32
    return %c0_i32, %c0_i32_0 : i32, i32
  }
  func.func @transform_4(%arg0: i32) -> (i32, i32) {
    %c0_i32 = arith.constant 0 : i32
    %c0_i32_0 = arith.constant 0 : i32
    %c0_i32_1 = arith.constant 0 : i32
    return %c0_i32, %c0_i32_0 : i32, i32
  }
  func.func @transform_5(%arg0: i32) -> (i32, i32) {
    %c0_i32 = arith.constant 0 : i32
    %c0_i32_0 = arith.constant 0 : i32
    %c0_i32_1 = arith.constant 0 : i32
    return %c0_i32, %c0_i32_0 : i32, i32
  }
  func.func @transform_6(%arg0: i32) -> (i32, i32) {
    %c0_i32 = arith.constant 0 : i32
    %c0_i32_0 = arith.constant 0 : i32
    %c0_i32_1 = arith.constant 0 : i32
    return %c0_i32, %c0_i32_0 : i32, i32
  }
  func.func @transform_7(%arg0: i32) -> (i32, i32) {
    %c0_i32 = arith.constant 0 : i32
    %c0_i32_0 = arith.constant 0 : i32
    %c0_i32_1 = arith.constant 0 : i32
    return %c0_i32, %c0_i32_0 : i32, i32
  }
  func.func @transform_8(%arg0: i32) -> (i32, i32) {
    %c0_i32 = arith.constant 0 : i32
    %c0_i32_0 = arith.constant 0 : i32
    %c0_i32_1 = arith.constant 0 : i32
    return %c0_i32, %c0_i32_0 : i32, i32
  }
  func.func @transform_9(%arg0: i32) -> (i32, i32) {
    %c0_i32 = arith.constant 0 : i32
    %c0_i32_0 = arith.constant 0 : i32
    %c0_i32_1 = arith.constant 0 : i32
    return %c0_i32, %c0_i32_0 : i32, i32
  }
  func.func @transform_10(%arg0: i32) -> i32 {
    %c0_i32 = arith.constant 0 : i32
    %c0_i32_0 = arith.constant 0 : i32
    return %c0_i32 : i32
  }
  func.func @transform_11(%arg0: i32) -> (i32, i32) {
    %c0_i32 = arith.constant 0 : i32
    %c0_i32_0 = arith.constant 0 : i32
    return %c0_i32, %arg0 : i32, i32
  }
}

</mosaic_0001>

<bundles_post_ra>
// kernel: super_complex_model.1
= control target key start
LH: loop header
LB: loop body
LE: loop exit
PB: predicated region body
PF: predicated region fallthrough
CT: control target
= control target key end

     0   :  { %s3454_s19 = smov 0   ;;  %s4165_s0 = inlined_call_operand.vmem [shape: f32[1024,32], index: 0, kind: input, shape index: {}]   ;;  %s4166_s1 = inlined_call_operand.vmem [shape: bf16[32,64], index: 1, kind: input, shape index: {}]   ;;  %s4167_s2 = inlined_call_operand.vmem [shape: bf16[1,64], index: 2, kind: input, shape index: {}]   ;;  %s4168_s3 = inlined_call_operand.vmem [shape: bf16[64,128], index: 3, kind: input, shape index: {}]   ;;  %s4169_s4 = inlined_call_operand.vmem [shape: bf16[1,128], index: 4, kind: input, shape index: {}]   ;;  %s4170_s5 = inlined_call_operand.vmem [shape: bf16[128,64], index: 5, kind: input, shape index: {}]   ;;  %s4171_s6 = inlined_call_operand.vmem [shape: bf16[1,64], index: 6, kind: input, shape index: {}]   ;;  %s4172_s7 = inlined_call_operand.vmem [shape: bf16[64,32], index: 7, kind: input, shape index: {}]   ;;  %s4173_s8 = inlined_call_operand.vmem [shape: bf16[1,32], index: 8, kind: input, shape index: {}]   ;;  %s4174_s9 = inlined_call_operand.vmem [shape: bf16[8,32], index: 9, kind: input, shape index: {}]   ;;  %s4175_s10 = inlined_call_operand.<no memory space> [shape: f32[1], index: 10, kind: input, shape index: {}]   ;;  %s4176_s11 = inlined_call_operand.vmem [shape: f32[8,1024], index: 11, kind: output, shape index: {}]  }
   0x1   :  { %16 = sst [smem:[#allocation2]] %s4175_s10 }
   0x2 LB: > { %s2738_s20 = sadd.s32 4294967295, %s3388_s19   ;;  %p2742_p0 = scmp.ge.s32.totalorder %s3388_s19, 1  ;;  %s3388_s19 = sphi %s3454_s19, %s22_s19  }
   0x3   : > { %p339_p1 = scmp.lt.s32.totalorder %s3388_s19, 3 }
   0x5   : > { %p340_p2 = pnand %p2742_p0, %p339_p1 }
   0x6   : > { %s2743_s10 = sshll.u32 (!%p340_p2), %s2738_s20, 6  ;;  %s2745_s16 = sshll.u32 (!%p340_p2), %s2738_s20, 2 }
   0x7   : > { %343 = sbr.rel (%p340_p2) target bundleno = 1225 (0x4c9), region = 64  ;;  %p380_p3 = scmp.lt.s32.totalorder (!%p340_p2), %s2743_s10, 127 }
   0x8   : > { %p386_p4 = scmp.lt.s32.totalorder (!%p340_p2), %s2745_s16, 7  ;;  %s2495_s17 = sld [smem:[#allocation2]] (!%p340_p2) }
   0xc   : > { %v3364_v0 = vld [vmem:[%s4166_s1 + $0x8] sm:$0xff]   ;;  %v3365_v1 = vld [vmem:[%s4166_s1] sm:$0xff]   ;;  %s4178_s10 = smov (!%p380_p3, %s2743_s10), 127  ;;  %v3366_v2 = vld [vmem:[%s4168_s3 + $0x18] sm:$0xff]   ;;  %vm504_vm0 = vcmask 261120   ;;  %vm1026_vm1 = vcmask 523264  }
   0xd   : > { %3047 = vmatprep.subr.bf16.mxu0 %v3364_v0  ;;  %s2744_s27 = sshll.u32 %s4178_s10, 3  ;;  %3115 = vmatprep.subr.bf16.mxu1 %v3366_v2  ;;  %v3367_v60 = vld [vmem:[%s4168_s3 + $0x10] sm:$0xff]   ;;  %s4180_s16 = smov (!%p386_p4, %s2745_s16), 7 }
   0xe   : > { %3048 = vmatpush3.bf16.msra.mxu0 %v3364_v0  ;;  %s3476_s30 = scalar_lea.vmem %s4165_s0, %s2744_s27  ;;  %3116 = vmatpush3.bf16.msra.mxu1 %v3366_v2  ;;  %v3368_v2 = vld [vmem:[%s4168_s3 + $0x8] sm:$0xff]   ;;  %s2746_s18 = sshll.u32 %s4180_s16, 3 }
   0xf   : > { %3049 = vmatprep.subr.bf16.mxu0 %v3365_v1  ;;  %v392_v3 = vld [vmem:[%s3476_s30] sm:$0xff]  ;;  %v393_v4 = vld [vmem:[%s3476_s30 + $0x8] sm:$0xff]  ;;  %v394_v5 = vld [vmem:[%s3476_s30 + $0x10] sm:$0xff]  ;;  %3117 = vmatprep.subr.bf16.mxu1 %v3367_v60  ;;  %s389_s10 = scalar_lea.vmem %s4176_s11, %s2746_s18 }
  0x10   : > { %v456_v6 = vpack.c.bf16 %v393_v4, %v392_v3  ;;  %v395_v7 = vld [vmem:[%s3476_s30 + $0x18] sm:$0xff]  ;;  %v396_v8 = vld [vmem:[%s3476_s30 + $0x20] sm:$0xff]  ;;  %v397_v9 = vld [vmem:[%s3476_s30 + $0x28] sm:$0xff] }
  0x11   : > { %v457_v10 = vpack.c.bf16 %v395_v7, %v394_v5  ;;  %v458_v11 = vpack.c.bf16 %v397_v9, %v396_v8  ;;  %v398_v12 = vld [vmem:[%s3476_s30 + $0x30] sm:$0xff]  ;;  %v399_v13 = vld [vmem:[%s3476_s30 + $0x38] sm:$0xff]  ;;  %v400_v14 = vld [vmem:[%s3476_s30 + $0x40] sm:$0xff] }
  0x12   : > { %3050 = vmatpush3.bf16.msra.mxu0 %v3365_v1  ;;  %3051 = vmatprep.mubr.msk.bf16.mxu0 %vm504_vm0, %v456_v6  ;;  %v401_v15 = vld [vmem:[%s3476_s30 + $0x48] sm:$0xff]  ;;  %v459_v16 = vpack.c.bf16 %v399_v13, %v398_v12  ;;  %v402_v18 = vld [vmem:[%s3476_s30 + $0x50] sm:$0xff]  ;;  %v403_v19 = vld [vmem:[%s3476_s30 + $0x58] sm:$0xff] }
  0x13   : > { %v460_v17 = vpack.c.bf16 %v401_v15, %v400_v14  ;;  %v404_v20 = vld [vmem:[%s3476_s30 + $0x60] sm:$0xff]  ;;  %v405_v21 = vld [vmem:[%s3476_s30 + $0x68] sm:$0xff]  ;;  %v461_v22 = vpack.c.bf16 %v403_v19, %v402_v18  ;;  %v406_v24 = vld [vmem:[%s3476_s30 + $0x70] sm:$0xff]  ;;  %3118 = vmatpush3.bf16.msra.mxu1 %v3367_v60 }
  0x14   : > { %v462_v23 = vpack.c.bf16 %v405_v21, %v404_v20  ;;  %v407_v25 = vld [vmem:[%s3476_s30 + $0x78] sm:$0xff]  ;;  %v408_v26 = vld [vmem:[%s3476_s30 + $0x80] sm:$0xff]  ;;  %v409_v27 = vld [vmem:[%s3476_s30 + $0x88] sm:$0xff]  ;;  %3119 = vmatprep.subr.bf16.mxu1 %v3368_v2 }
  0x15   : > { %3052 = vmatmul.mubr.msk.bf16.vlgmr.msra.gmra.mxu0 %vm504_vm0, %v457_v10  ;;  %v463_v28 = vpack.c.bf16 %v407_v25, %v406_v24  ;;  %v464_v29 = vpack.c.bf16 %v409_v27, %v408_v26  ;;  %v410_v30 = vld [vmem:[%s3476_s30 + $0x90] sm:$0xff]  ;;  %v411_v31 = vld [vmem:[%s3476_s30 + $0x98] sm:$0xff]  ;;  %v412_v32 = vld [vmem:[%s3476_s30 + $0xa0] sm:$0xff] }
  0x16   : > { %3055 = vmatprep.mubr.msk.bf16.mxu0 %vm504_vm0, %v458_v11  ;;  %v413_v33 = vld [vmem:[%s3476_s30 + $0xa8] sm:$0xff]  ;;  %v465_v34 = vpack.c.bf16 %v411_v31, %v410_v30  ;;  %v414_v36 = vld [vmem:[%s3476_s30 + $0xb0] sm:$0xff]  ;;  %v415_v37 = vld [vmem:[%s3476_s30 + $0xb8] sm:$0xff] }
  0x17   : > { %v466_v35 = vpack.c.bf16 %v413_v33, %v412_v32  ;;  %v416_v38 = vld [vmem:[%s3476_s30 + $0xc0] sm:$0xff]  ;;  %v417_v39 = vld [vmem:[%s3476_s30 + $0xc8] sm:$0xff]  ;;  %v467_v40 = vpack.c.bf16 %v415_v37, %v414_v36  ;;  %v418_v42 = vld [vmem:[%s3476_s30 + $0xd0] sm:$0xff]  ;;  %3120 = vmatpush3.bf16.msra.mxu1 %v3368_v2 }
  0x18   : > { %v468_v41 = vpack.c.bf16 %v417_v39, %v416_v38  ;;  %v419_v43 = vld [vmem:[%s3476_s30 + $0xd8] sm:$0xff]  ;;  %v420_v44 = vld [vmem:[%s3476_s30 + $0xe0] sm:$0xff]  ;;  %v421_v45 = vld [vmem:[%s3476_s30 + $0xe8] sm:$0xff]  ;;  %v926_v38 = vlaneseq }
  0x19   : > { %v469_v46 = vpack.c.bf16 %v419_v43, %v418_v42  ;;  %v470_v47 = vpack.c.bf16 %v421_v45, %v420_v44  ;;  %v422_v48 = vld [vmem:[%s3476_s30 + $0xf0] sm:$0xff]  ;;  %v423_v49 = vld [vmem:[%s3476_s30 + $0xf8] sm:$0xff]  ;;  %v424_v50 = vld [vmem:[%s3476_s30 + $0x100] sm:$0xff] }
  0x1a   : > { %v425_v51 = vld [vmem:[%s3476_s30 + $0x108] sm:$0xff]  ;;  %v471_v52 = vpack.c.bf16 %v423_v49, %v422_v48  ;;  %v426_v54 = vld [vmem:[%s3476_s30 + $0x110] sm:$0xff]  ;;  %v427_v55 = vld [vmem:[%s3476_s30 + $0x118] sm:$0xff]  ;;  %v927_v39 = vshrl.u32 %v926_v38, 7 }
  0x1b   : > { %v472_v53 = vpack.c.bf16 %v425_v51, %v424_v50  ;;  %v428_v56 = vld [vmem:[%s3476_s30 + $0x120] sm:$0xff]  ;;  %v429_v57 = vld [vmem:[%s3476_s30 + $0x128] sm:$0xff]  ;;  %v473_v58 = vpack.c.bf16 %v427_v55, %v426_v54  ;;  %v430_v61 = vld [vmem:[%s3476_s30 + $0x130] sm:$0xff] }
  0x1c   : > { %v474_v59 = vpack.c.bf16 %v429_v57, %v428_v56  ;;  %v431_v62 = vld [vmem:[%s3476_s30 + $0x138] sm:$0xff]  ;;  %v432_v63 = vld [vmem:[%s3476_s30 + $0x140] sm:$0xff]  ;;  %v433_v0 = vld [vmem:[%s3476_s30 + $0x148] sm:$0xff]  ;;  %v3586_v43 = vsub.s32 0, %v927_v39  ;;  %v3390_v57 = vmov 0  }
  0x1d   : > { %3056 = vmatmul.mubr.msk.bf16.gmra.mxu0 %vm504_vm0, %v459_v16  ;;  %v475_v1 = vpack.c.bf16 %v431_v62, %v430_v61  ;;  %v476_v3 = vpack.c.bf16 %v433_v0, %v432_v63  ;;  %v3369_v4 = vld [vmem:[%s4168_s3] sm:$0xff]   ;;  %v434_v5 = vld [vmem:[%s3476_s30 + $0x150] sm:$0xff]  ;;  %v435_v6 = vld [vmem:[%s3476_s30 + $0x158] sm:$0xff] }
  0x1e   : > { %3059 = vmatprep.mubr.msk.bf16.mxu0 %vm504_vm0, %v460_v17  ;;  %v436_v7 = vld [vmem:[%s3476_s30 + $0x160] sm:$0xff]  ;;  %v437_v8 = vld [vmem:[%s3476_s30 + $0x168] sm:$0xff]  ;;  %3121 = vmatprep.subr.bf16.mxu1 %v3369_v4  ;;  %v477_v9 = vpack.c.bf16 %v435_v6, %v434_v5  ;;  %v438_v11 = vld [vmem:[%s3476_s30 + $0x170] sm:$0xff] }
  0x1f   : > { %3122 = vmatpush3.bf16.msra.mxu1 %v3369_v4  ;;  %v478_v10 = vpack.c.bf16 %v437_v8, %v436_v7  ;;  %v439_v12 = vld [vmem:[%s3476_s30 + $0x178] sm:$0xff]  ;;  %v440_v13 = vld [vmem:[%s3476_s30 + $0x180] sm:$0xff]  ;;  %v441_v14 = vld [vmem:[%s3476_s30 + $0x188] sm:$0xff] }
  0x20   : > { %v479_v15 = vpack.c.bf16 %v439_v12, %v438_v11  ;;  %v480_v16 = vpack.c.bf16 %v441_v14, %v440_v13  ;;  %v442_v17 = vld [vmem:[%s3476_s30 + $0x190] sm:$0xff]  ;;  %v443_v18 = vld [vmem:[%s3476_s30 + $0x198] sm:$0xff]  ;;  %v444_v19 = vld [vmem:[%s3476_s30 + $0x1a0] sm:$0xff] }
  0x21   : > { %v445_v20 = vld [vmem:[%s3476_s30 + $0x1a8] sm:$0xff]  ;;  %v481_v21 = vpack.c.bf16 %v443_v18, %v442_v17  ;;  %v447_v24 = vld [vmem:[%s3476_s30 + $0x1b8] sm:$0xff]  ;;  %v448_v25 = vld [vmem:[%s3476_s30 + $0x1c0] sm:$0xff] }
  0x22   : > { %v449_v26 = vld [vmem:[%s3476_s30 + $0x1c8] sm:$0xff]  ;;  %v451_v30 = vld [vmem:[%s3476_s30 + $0x1d8] sm:$0xff]  ;;  %v452_v31 = vld [vmem:[%s3476_s30 + $0x1e0] sm:$0xff] }
  0x23   : > { %v453_v32 = vld [vmem:[%s3476_s30 + $0x1e8] sm:$0xff]  ;;  %v455_v36 = vld [vmem:[%s3476_s30 + $0x1f8] sm:$0xff]  ;;  %v3371_v50 = vld [vmem:[%s4170_s5 + $0x30] sm:$0xff]  }
  0x24   : > { %v3370_v49 = vld [vmem:[%s4170_s5 + $0x38] sm:$0xff]   ;;  %v3372_v56 = vld [vmem:[%s4170_s5 + $0x28] sm:$0xff]   ;;  %v3373_v63 = vld [vmem:[%s4170_s5 + $0x20] sm:$0xff]  }
  0x25   : > { %3060 = vmatmul.mubr.msk.bf16.gmra.mxu0 %vm504_vm0, %v461_v22  ;;  %v482_v22 = vpack.c.bf16 %v445_v20, %v444_v19  ;;  %3187 = vmatprep.subr.bf16.mxu0 %v3370_v49  ;;  %v3374_v5 = vld [vmem:[%s4170_s5 + $0x18] sm:$0xff]  }
  0x26   : > { %3063 = vmatprep.mubr.msk.bf16.mxu0 %vm504_vm0, %v462_v23  ;;  %v446_v23 = vld [vmem:[%s3476_s30 + $0x1b0] sm:$0xff]  ;;  %3188 = vmatpush3.bf16.msra.mxu0 %v3370_v49 }
  0x27   : > { %v483_v27 = vpack.c.bf16 %v447_v24, %v446_v23  ;;  %3189 = vmatprep.subr.bf16.mxu0 %v3371_v50 }
  0x2a   : > { %3190 = vmatpush3.bf16.msra.mxu0 %v3371_v50 }
  0x2b   : > { %3191 = vmatprep.subr.bf16.mxu0 %v3372_v56 }
  0x2d   : > { %3064 = vmatmul.mubr.msk.bf16.gmra.mxu0 %vm504_vm0, %v463_v28  ;;  %v484_v28 = vpack.c.bf16 %v449_v26, %v448_v25 }
  0x2e   : > { %3067 = vmatprep.mubr.msk.bf16.mxu0 %vm504_vm0, %v464_v29  ;;  %v450_v29 = vld [vmem:[%s3476_s30 + $0x1d0] sm:$0xff]  ;;  %3192 = vmatpush3.bf16.msra.mxu0 %v3372_v56 }
  0x2f   : > { %v485_v33 = vpack.c.bf16 %v451_v30, %v450_v29  ;;  %3193 = vmatprep.subr.bf16.mxu0 %v3373_v63 }
  0x32   : > { %3194 = vmatpush3.bf16.msra.mxu0 %v3373_v63 }
  0x33   : > { %3195 = vmatprep.subr.bf16.mxu0 %v3374_v5 }
  0x35   : > { %3068 = vmatmul.mubr.msk.bf16.gmra.mxu0 %vm504_vm0, %v465_v34  ;;  %v486_v34 = vpack.c.bf16 %v453_v32, %v452_v31 }
  0x36   : > { %3071 = vmatprep.mubr.msk.bf16.mxu0 %vm504_vm0, %v466_v35  ;;  %v454_v35 = vld [vmem:[%s3476_s30 + $0x1f0] sm:$0xff]  ;;  %3196 = vmatpush3.bf16.msra.mxu0 %v3374_v5 }
  0x37   : > { %v487_v37 = vpack.c.bf16 %v455_v36, %v454_v35 }
  0x3d   : > { %3072 = vmatmul.mubr.msk.bf16.gmra.mxu0 %vm504_vm0, %v467_v40  ;;  %v922_v40 = vld [vmem:[%s4167_s2] sm:$0x1] }
  0x3e   : > { %3075 = vmatprep.mubr.msk.bf16.mxu0 %vm504_vm0, %v468_v41  ;;  %v924_v42 = vpack.i.b16 %v922_v40, %v922_v40 }
  0x45   : > { %3076 = vmatmul.mubr.msk.bf16.gmra.mxu0 %vm504_vm0, %v469_v46  ;;  %v3589_v46 = vrot.slane %v924_v42, %v3586_v43 }
  0x46   : > { %3079 = vmatprep.mubr.msk.bf16.mxu0 %vm504_vm0, %v470_v47 }
  0x4d   : > { %3080 = vmatmul.mubr.msk.bf16.gmra.mxu0 %vm504_vm0, %v471_v52 }
  0x4e   : > { %3083 = vmatprep.mubr.msk.bf16.mxu0 %vm504_vm0, %v472_v53 }
  0x55   : > { %3084 = vmatmul.mubr.msk.bf16.gmra.mxu0 %vm504_vm0, %v473_v58 }
  0x56   : > { %3087 = vmatprep.mubr.msk.bf16.mxu0 %vm504_vm0, %v474_v59 }
  0x5d   : > { %3088 = vmatmul.mubr.msk.bf16.gmra.mxu0 %vm504_vm0, %v475_v1 }
  0x5e   : > { %3091 = vmatprep.mubr.msk.bf16.mxu0 %vm504_vm0, %v476_v3 }
  0x65   : > { %3092 = vmatmul.mubr.msk.bf16.gmra.mxu0 %vm504_vm0, %v477_v9 }
  0x66   : > { %3095 = vmatprep.mubr.msk.bf16.mxu0 %vm504_vm0, %v478_v10 }
  0x6d   : > { %3096 = vmatmul.mubr.msk.bf16.gmra.mxu0 %vm504_vm0, %v479_v15 }
  0x6e   : > { %3099 = vmatprep.mubr.msk.bf16.mxu0 %vm504_vm0, %v480_v16 }
  0x75   : > { %3100 = vmatmul.mubr.msk.bf16.gmra.mxu0 %vm504_vm0, %v481_v21 }
  0x76   : > { %3103 = vmatprep.mubr.msk.bf16.mxu0 %vm504_vm0, %v482_v22 }
  0x7d   : > { %3104 = vmatmul.mubr.msk.bf16.gmra.mxu0 %vm504_vm0, %v483_v27 }
  0x7e   : > { %3107 = vmatprep.mubr.msk.bf16.mxu0 %vm504_vm0, %v484_v28 }
  0x85   : > { %3108 = vmatmul.mubr.msk.bf16.gmra.mxu0 %vm504_vm0, %v485_v33 }
  0x86   : > { %3111 = vmatprep.mubr.msk.bf16.mxu0 %vm504_vm0, %v486_v34 }
  0x8d   : > { %3112 = vmatmul.mubr.msk.bf16.gmra.mxu0 %vm504_vm0, %v487_v37 }
  0xd5   : > { %v3053_v41 = vpop.f32.mrf.mxu0 }
  0xd7   : > { %v635_v44 = vpop.f32.mrf.mxu0 }
  0xd9   : > { %v3054_v45 = vpop.f32.mrf.mxu0 }
  0xda   : > { %v891_v47 = vpack.c.bf16 %v3054_v45, %v3053_v41 }
  0xdb   : > { %v638_v48 = vpop.f32.mrf.mxu0 }
  0xdc   : > { %v890_v51 = vpack.c.bf16 %v638_v48, %v635_v44  ;;  %v931_v52 = vadd.bf16 %v3589_v46, %v891_v47 }
  0xdd   : > { %v3057_v53 = vpop.f32.mrf.mxu0 }
  0xde   : > { %v930_v54 = vadd.bf16 %v3589_v46, %v890_v51  ;;  %v963_v59 = vmax.bf16 %v3390_v57, %v931_v52 }
  0xdf   : > { %v651_v55 = vpop.f32.mrf.mxu0 }
  0xe0   : > { %v962_v58 = vmax.bf16 %v3390_v57, %v930_v54 }
  0xe1   : > { %v3058_v60 = vpop.f32.mrf.mxu0 }
  0xe2   : > { %v893_v61 = vpack.c.bf16 %v3058_v60, %v3057_v53  ;;  %3123 = vmatprep.mubr.msk.bf16.mxu1 %vm1026_vm1, %v962_v58 }
  0xe3   : > { %v654_v62 = vpop.f32.mrf.mxu0  ;;  %3124 = vmatmul.mubr.msk.bf16.vlgmr.msra.gmra.mxu1 %vm1026_vm1, %v963_v59 }
  0xe4   : > { %v892_v0 = vpack.c.bf16 %v654_v62, %v651_v55  ;;  %v933_v1 = vadd.bf16 %v3589_v46, %v893_v61 }
  0xe5   : > { %v3061_v2 = vpop.f32.mrf.mxu0 }
  0xe6   : > { %v932_v3 = vadd.bf16 %v3589_v46, %v892_v0  ;;  %v965_v7 = vmax.bf16 %v3390_v57, %v933_v1 }
  0xe7   : > { %v667_v4 = vpop.f32.mrf.mxu0 }
  0xe8   : > { %v964_v6 = vmax.bf16 %v3390_v57, %v932_v3 }
  0xe9   : > { %v3062_v8 = vpop.f32.mrf.mxu0 }
  0xea   : > { %v895_v9 = vpack.c.bf16 %v3062_v8, %v3061_v2  ;;  %3127 = vmatprep.mubr.msk.bf16.mxu1 %vm1026_vm1, %v964_v6 }
  0xeb   : > { %v670_v10 = vpop.f32.mrf.mxu0  ;;  %3128 = vmatmul.mubr.msk.bf16.gmra.mxu1 %vm1026_vm1, %v965_v7 }
  0xec   : > { %v894_v11 = vpack.c.bf16 %v670_v10, %v667_v4  ;;  %v935_v12 = vadd.bf16 %v3589_v46, %v895_v9 }
  0xed   : > { %v3065_v13 = vpop.f32.mrf.mxu0 }
  0xee   : > { %v934_v14 = vadd.bf16 %v3589_v46, %v894_v11  ;;  %v967_v17 = vmax.bf16 %v3390_v57, %v935_v12 }
  0xef   : > { %v683_v15 = vpop.f32.mrf.mxu0 }
  0xf0   : > { %v966_v16 = vmax.bf16 %v3390_v57, %v934_v14 }
  0xf1   : > { %v3066_v18 = vpop.f32.mrf.mxu0 }
  0xf2   : > { %v897_v19 = vpack.c.bf16 %v3066_v18, %v3065_v13  ;;  %3131 = vmatprep.mubr.msk.bf16.mxu1 %vm1026_vm1, %v966_v16 }
  0xf3   : > { %v686_v20 = vpop.f32.mrf.mxu0  ;;  %3132 = vmatmul.mubr.msk.bf16.gmra.mxu1 %vm1026_vm1, %v967_v17 }
  0xf4   : > { %v896_v21 = vpack.c.bf16 %v686_v20, %v683_v15  ;;  %v937_v22 = vadd.bf16 %v3589_v46, %v897_v19  ;;  %v3375_v20 = vld [vmem:[%s4170_s5 + $0x10] sm:$0xff]  }
  0xf5   : > { %v3069_v23 = vpop.f32.mrf.mxu0  ;;  %3197 = vmatprep.subr.bf16.mxu0 %v3375_v20 }
  0xf6   : > { %v936_v24 = vadd.bf16 %v3589_v46, %v896_v21  ;;  %v969_v27 = vmax.bf16 %v3390_v57, %v937_v22  ;;  %3198 = vmatpush3.bf16.msra.mxu0 %v3375_v20 }
  0xf7   : > { %v699_v25 = vpop.f32.mrf.mxu0 }
  0xf8   : > { %v968_v26 = vmax.bf16 %v3390_v57, %v936_v24 }
  0xf9   : > { %v3070_v28 = vpop.f32.mrf.mxu0 }
  0xfa   : > { %v899_v29 = vpack.c.bf16 %v3070_v28, %v3069_v23  ;;  %3135 = vmatprep.mubr.msk.bf16.mxu1 %vm1026_vm1, %v968_v26  ;;  %v3376_v26 = vld [vmem:[%s4170_s5 + $0x8] sm:$0xff]  }
  0xfb   : > { %v702_v30 = vpop.f32.mrf.mxu0  ;;  %3136 = vmatmul.mubr.msk.bf16.gmra.mxu1 %vm1026_vm1, %v969_v27  ;;  %3199 = vmatprep.subr.bf16.mxu0 %v3376_v26 }
  0xfc   : > { %v898_v31 = vpack.c.bf16 %v702_v30, %v699_v25  ;;  %v939_v32 = vadd.bf16 %v3589_v46, %v899_v29  ;;  %3200 = vmatpush3.bf16.msra.mxu0 %v3376_v26 }
  0xfd   : > { %v3073_v33 = vpop.f32.mrf.mxu0 }
  0xfe   : > { %v938_v34 = vadd.bf16 %v3589_v46, %v898_v31  ;;  %v971_v37 = vmax.bf16 %v3390_v57, %v939_v32  ;;  %v3377_v32 = vld [vmem:[%s4170_s5] sm:$0xff]  }
  0xff   : > { %v715_v35 = vpop.f32.mrf.mxu0  ;;  %3201 = vmatprep.subr.bf16.mxu0 %v3377_v32 }
 0x100   : > { %v970_v36 = vmax.bf16 %v3390_v57, %v938_v34  ;;  %3202 = vmatpush3.bf16.msra.mxu0 %v3377_v32 }
 0x101   : > { %v3074_v38 = vpop.f32.mrf.mxu0 }
 0x102   : > { %v901_v39 = vpack.c.bf16 %v3074_v38, %v3073_v33  ;;  %3139 = vmatprep.mubr.msk.bf16.mxu1 %vm1026_vm1, %v970_v36 }
 0x103   : > { %v718_v40 = vpop.f32.mrf.mxu0  ;;  %3140 = vmatmul.mubr.msk.bf16.gmra.mxu1 %vm1026_vm1, %v971_v37 }
 0x104   : > { %v900_v41 = vpack.c.bf16 %v718_v40, %v715_v35  ;;  %v941_v42 = vadd.bf16 %v3589_v46, %v901_v39 }
 0x105   : > { %v3077_v44 = vpop.f32.mrf.mxu0 }
 0x106   : > { %v940_v45 = vadd.bf16 %v3589_v46, %v900_v41  ;;  %v973_v49 = vmax.bf16 %v3390_v57, %v941_v42 }
 0x107   : > { %v731_v47 = vpop.f32.mrf.mxu0 }
 0x108   : > { %v972_v48 = vmax.bf16 %v3390_v57, %v940_v45 }
 0x109   : > { %v3078_v50 = vpop.f32.mrf.mxu0 }
 0x10a   : > { %v903_v51 = vpack.c.bf16 %v3078_v50, %v3077_v44  ;;  %3143 = vmatprep.mubr.msk.bf16.mxu1 %vm1026_vm1, %v972_v48 }
 0x10b   : > { %v734_v52 = vpop.f32.mrf.mxu0  ;;  %3144 = vmatmul.mubr.msk.bf16.gmra.mxu1 %vm1026_vm1, %v973_v49 }
 0x10c   : > { %v902_v53 = vpack.c.bf16 %v734_v52, %v731_v47  ;;  %v943_v54 = vadd.bf16 %v3589_v46, %v903_v51 }
 0x10d   : > { %v3081_v55 = vpop.f32.mrf.mxu0 }
 0x10e   : > { %v942_v56 = vadd.bf16 %v3589_v46, %v902_v53  ;;  %v975_v60 = vmax.bf16 %v3390_v57, %v943_v54 }
 0x10f   : > { %v747_v58 = vpop.f32.mrf.mxu0 }
 0x110   : > { %v974_v59 = vmax.bf16 %v3390_v57, %v942_v56 }
 0x111   : > { %v3082_v61 = vpop.f32.mrf.mxu0 }
 0x112   : > { %v905_v62 = vpack.c.bf16 %v3082_v61, %v3081_v55  ;;  %3147 = vmatprep.mubr.msk.bf16.mxu1 %vm1026_vm1, %v974_v59 }
 0x113   : > { %v750_v63 = vpop.f32.mrf.mxu0  ;;  %3148 = vmatmul.mubr.msk.bf16.gmra.mxu1 %vm1026_vm1, %v975_v60 }
 0x114   : > { %v904_v0 = vpack.c.bf16 %v750_v63, %v747_v58  ;;  %v945_v1 = vadd.bf16 %v3589_v46, %v905_v62 }
 0x115   : > { %v3085_v2 = vpop.f32.mrf.mxu0 }
 0x116   : > { %v944_v3 = vadd.bf16 %v3589_v46, %v904_v0  ;;  %v977_v6 = vmax.bf16 %v3390_v57, %v945_v1 }
 0x117   : > { %v763_v4 = vpop.f32.mrf.mxu0 }
 0x118   : > { %v976_v5 = vmax.bf16 %v3390_v57, %v944_v3 }
 0x119   : > { %v3086_v7 = vpop.f32.mrf.mxu0 }
 0x11a   : > { %v907_v8 = vpack.c.bf16 %v3086_v7, %v3085_v2  ;;  %3151 = vmatprep.mubr.msk.bf16.mxu1 %vm1026_vm1, %v976_v5 }
 0x11b   : > { %v766_v9 = vpop.f32.mrf.mxu0  ;;  %3152 = vmatmul.mubr.msk.bf16.gmra.mxu1 %vm1026_vm1, %v977_v6 }
 0x11c   : > { %v906_v10 = vpack.c.bf16 %v766_v9, %v763_v4  ;;  %v947_v11 = vadd.bf16 %v3589_v46, %v907_v8 }
 0x11d   : > { %v3089_v12 = vpop.f32.mrf.mxu0 }
 0x11e   : > { %v946_v13 = vadd.bf16 %v3589_v46, %v906_v10  ;;  %v979_v16 = vmax.bf16 %v3390_v57, %v947_v11 }
 0x11f   : > { %v779_v14 = vpop.f32.mrf.mxu0 }
 0x120   : > { %v978_v15 = vmax.bf16 %v3390_v57, %v946_v13 }
 0x121   : > { %v3090_v17 = vpop.f32.mrf.mxu0 }
 0x122   : > { %v909_v18 = vpack.c.bf16 %v3090_v17, %v3089_v12  ;;  %3155 = vmatprep.mubr.msk.bf16.mxu1 %vm1026_vm1, %v978_v15 }
 0x123   : > { %v782_v19 = vpop.f32.mrf.mxu0  ;;  %3156 = vmatmul.mubr.msk.bf16.gmra.mxu1 %vm1026_vm1, %v979_v16 }
 0x124   : > { %v908_v21 = vpack.c.bf16 %v782_v19, %v779_v14  ;;  %v949_v22 = vadd.bf16 %v3589_v46, %v909_v18 }
 0x125   : > { %v3093_v23 = vpop.f32.mrf.mxu0 }
 0x126   : > { %v948_v24 = vadd.bf16 %v3589_v46, %v908_v21  ;;  %v981_v28 = vmax.bf16 %v3390_v57, %v949_v22 }
 0x127   : > { %v795_v25 = vpop.f32.mrf.mxu0 }
 0x128   : > { %v980_v27 = vmax.bf16 %v3390_v57, %v948_v24 }
 0x129   : > { %v3094_v29 = vpop.f32.mrf.mxu0 }
 0x12a   : > { %v911_v30 = vpack.c.bf16 %v3094_v29, %v3093_v23  ;;  %3159 = vmatprep.mubr.msk.bf16.mxu1 %vm1026_vm1, %v980_v27  ;;  %v1444_v27 = vld [vmem:[%s4169_s4] sm:$0x1] }
 0x12b   : > { %v798_v31 = vpop.f32.mrf.mxu0  ;;  %3160 = vmatmul.mubr.msk.bf16.gmra.mxu1 %vm1026_vm1, %v981_v28  ;;  %v1446_v29 = vpack.i.b16 %v1444_v27, %v1444_v27 }
 0x12c   : > { %v910_v33 = vpack.c.bf16 %v798_v31, %v795_v25  ;;  %v951_v34 = vadd.bf16 %v3589_v46, %v911_v30 }
 0x12d   : > { %v3097_v35 = vpop.f32.mrf.mxu0  ;;  %v3715_v32 = vrot.slane %v1446_v29, %v3586_v43 }
 0x12e   : > { %v950_v36 = vadd.bf16 %v3589_v46, %v910_v33  ;;  %v983_v39 = vmax.bf16 %v3390_v57, %v951_v34  ;;  %v3378_v34 = vld [vmem:[%s4172_s7 + $0x18] sm:$0xff]  }
 0x12f   : > { %v811_v37 = vpop.f32.mrf.mxu0  ;;  %3267 = vmatprep.subr.bf16.mxu1 %v3378_v34 }
 0x130   : > { %v982_v38 = vmax.bf16 %v3390_v57, %v950_v36  ;;  %3268 = vmatpush3.bf16.msra.mxu1 %v3378_v34 }
 0x131   : > { %v3098_v40 = vpop.f32.mrf.mxu0 }
 0x132   : > { %v913_v41 = vpack.c.bf16 %v3098_v40, %v3097_v35  ;;  %3163 = vmatprep.mubr.msk.bf16.mxu1 %vm1026_vm1, %v982_v38  ;;  %v3379_v35 = vld [vmem:[%s4172_s7 + $0x10] sm:$0xff]  }
 0x133   : > { %v814_v42 = vpop.f32.mrf.mxu0  ;;  %3164 = vmatmul.mubr.msk.bf16.gmra.mxu1 %vm1026_vm1, %v983_v39  ;;  %3269 = vmatprep.subr.bf16.mxu1 %v3379_v35 }
 0x134   : > { %v912_v44 = vpack.c.bf16 %v814_v42, %v811_v37  ;;  %v953_v45 = vadd.bf16 %v3589_v46, %v913_v41  ;;  %3270 = vmatpush3.bf16.msra.mxu1 %v3379_v35 }
 0x135   : > { %v3101_v47 = vpop.f32.mrf.mxu0 }
 0x136   : > { %v952_v48 = vadd.bf16 %v3589_v46, %v912_v44  ;;  %v985_v51 = vmax.bf16 %v3390_v57, %v953_v45 }
 0x137   : > { %v827_v49 = vpop.f32.mrf.mxu0 }
 0x138   : > { %v984_v50 = vmax.bf16 %v3390_v57, %v952_v48 }
 0x139   : > { %v3102_v52 = vpop.f32.mrf.mxu0 }
 0x13a   : > { %v915_v53 = vpack.c.bf16 %v3102_v52, %v3101_v47  ;;  %3167 = vmatprep.mubr.msk.bf16.mxu1 %vm1026_vm1, %v984_v50 }
 0x13b   : > { %v830_v54 = vpop.f32.mrf.mxu0  ;;  %3168 = vmatmul.mubr.msk.bf16.gmra.mxu1 %vm1026_vm1, %v985_v51 }
 0x13c   : > { %v914_v55 = vpack.c.bf16 %v830_v54, %v827_v49  ;;  %v955_v56 = vadd.bf16 %v3589_v46, %v915_v53 }
 0x13d   : > { %v3105_v58 = vpop.f32.mrf.mxu0 }
 0x13e   : > { %v954_v59 = vadd.bf16 %v3589_v46, %v914_v55  ;;  %v987_v62 = vmax.bf16 %v3390_v57, %v955_v56 }
 0x13f   : > { %v843_v60 = vpop.f32.mrf.mxu0 }
 0x140   : > { %v986_v61 = vmax.bf16 %v3390_v57, %v954_v59 }
 0x141   : > { %v3106_v63 = vpop.f32.mrf.mxu0 }
 0x142   : > { %v917_v0 = vpack.c.bf16 %v3106_v63, %v3105_v58  ;;  %3171 = vmatprep.mubr.msk.bf16.mxu1 %vm1026_vm1, %v986_v61 }
 0x143   : > { %v846_v1 = vpop.f32.mrf.mxu0  ;;  %3172 = vmatmul.mubr.msk.bf16.gmra.mxu1 %vm1026_vm1, %v987_v62 }
 0x144   : > { %v916_v2 = vpack.c.bf16 %v846_v1, %v843_v60  ;;  %v957_v3 = vadd.bf16 %v3589_v46, %v917_v0 }
 0x145   : > { %v3109_v4 = vpop.f32.mrf.mxu0 }
 0x146   : > { %v956_v5 = vadd.bf16 %v3589_v46, %v916_v2  ;;  %v989_v8 = vmax.bf16 %v3390_v57, %v957_v3 }
 0x147   : > { %v859_v6 = vpop.f32.mrf.mxu0 }
 0x148   : > { %v988_v7 = vmax.bf16 %v3390_v57, %v956_v5 }
 0x149   : > { %v3110_v9 = vpop.f32.mrf.mxu0 }
 0x14a   : > { %v919_v10 = vpack.c.bf16 %v3110_v9, %v3109_v4  ;;  %3175 = vmatprep.mubr.msk.bf16.mxu1 %vm1026_vm1, %v988_v7 }
 0x14b   : > { %v862_v11 = vpop.f32.mrf.mxu0  ;;  %3176 = vmatmul.mubr.msk.bf16.gmra.mxu1 %vm1026_vm1, %v989_v8 }
 0x14c   : > { %v918_v12 = vpack.c.bf16 %v862_v11, %v859_v6  ;;  %v959_v13 = vadd.bf16 %v3589_v46, %v919_v10 }
 0x14d   : > { %v3113_v14 = vpop.f32.mrf.mxu0 }
 0x14e   : > { %v958_v15 = vadd.bf16 %v3589_v46, %v918_v12  ;;  %v991_v18 = vmax.bf16 %v3390_v57, %v959_v13 }
 0x14f   : > { %v875_v16 = vpop.f32.mrf.mxu0 }
 0x150   : > { %v990_v17 = vmax.bf16 %v3390_v57, %v958_v15 }
 0x151   : > { %v3114_v19 = vpop.f32.mrf.mxu0 }
 0x152   : > { %v921_v20 = vpack.c.bf16 %v3114_v19, %v3113_v14  ;;  %3179 = vmatprep.mubr.msk.bf16.mxu1 %vm1026_vm1, %v990_v17 }
 0x153   : > { %v878_v21 = vpop.f32.mrf.mxu0  ;;  %3180 = vmatmul.mubr.msk.bf16.gmra.mxu1 %vm1026_vm1, %v991_v18 }
 0x154   : > { %v920_v22 = vpack.c.bf16 %v878_v21, %v875_v16  ;;  %v961_v23 = vadd.bf16 %v3589_v46, %v921_v20 }
 0x156   : > { %v960_v24 = vadd.bf16 %v3589_v46, %v920_v22  ;;  %v993_v26 = vmax.bf16 %v3390_v57, %v961_v23 }
 0x158   : > { %v992_v25 = vmax.bf16 %v3390_v57, %v960_v24 }
 0x15a   : > { %3183 = vmatprep.mubr.msk.bf16.mxu1 %vm1026_vm1, %v992_v25 }
 0x15b   : > { %3184 = vmatmul.mubr.msk.bf16.gmra.mxu1 %vm1026_vm1, %v993_v26 }
 0x1a3   : > { %v3125_v28 = vpop.f32.mrf.mxu1 }
 0x1a5   : > { %v1157_v30 = vpop.f32.mrf.mxu1 }
 0x1a7   : > { %v3126_v31 = vpop.f32.mrf.mxu1 }
 0x1a8   : > { %v1413_v46 = vpack.c.bf16 %v3126_v31, %v3125_v28 }
 0x1a9   : > { %v1160_v33 = vpop.f32.mrf.mxu1 }
 0x1aa   : > { %v1412_v36 = vpack.c.bf16 %v1160_v33, %v1157_v30  ;;  %v1453_v37 = vadd.bf16 %v3715_v32, %v1413_v46 }
 0x1ab   : > { %v3129_v38 = vpop.f32.mrf.mxu1 }
 0x1ac   : > { %v1452_v39 = vadd.bf16 %v3715_v32, %v1412_v36  ;;  %v1485_v42 = vmax.bf16 %v3390_v57, %v1453_v37 }
 0x1ad   : > { %v1173_v40 = vpop.f32.mrf.mxu1 }
 0x1ae   : > { %v1484_v41 = vmax.bf16 %v3390_v57, %v1452_v39 }
 0x1af   : > { %v3130_v44 = vpop.f32.mrf.mxu1 }
 0x1b0   : > { %v1415_v45 = vpack.c.bf16 %v3130_v44, %v3129_v38  ;;  %3203 = vmatprep.mubr.bf16.mxu0 %v1484_v41 }
 0x1b1   : > { %v1176_v47 = vpop.f32.mrf.mxu1  ;;  %3204 = vmatmul.mubr.bf16.vlgmr.msra.gmra.mxu0 %v1485_v42 }
 0x1b2   : > { %v1414_v48 = vpack.c.bf16 %v1176_v47, %v1173_v40  ;;  %v1455_v49 = vadd.bf16 %v3715_v32, %v1415_v45 }
 0x1b3   : > { %v3133_v50 = vpop.f32.mrf.mxu1 }
 0x1b4   : > { %v1454_v51 = vadd.bf16 %v3715_v32, %v1414_v48  ;;  %v1487_v55 = vmax.bf16 %v3390_v57, %v1455_v49 }
 0x1b5   : > { %v1189_v52 = vpop.f32.mrf.mxu1 }
 0x1b6   : > { %v1486_v53 = vmax.bf16 %v3390_v57, %v1454_v51 }
 0x1b7   : > { %v3134_v54 = vpop.f32.mrf.mxu1 }
 0x1b8   : > { %v1417_v56 = vpack.c.bf16 %v3134_v54, %v3133_v50  ;;  %3207 = vmatprep.mubr.bf16.mxu0 %v1486_v53 }
 0x1b9   : > { %v1192_v58 = vpop.f32.mrf.mxu1  ;;  %3208 = vmatmul.mubr.bf16.gmra.mxu0 %v1487_v55 }
 0x1ba   : > { %v1416_v59 = vpack.c.bf16 %v1192_v58, %v1189_v52  ;;  %v1457_v60 = vadd.bf16 %v3715_v32, %v1417_v56 }
 0x1bb   : > { %v3137_v61 = vpop.f32.mrf.mxu1 }
 0x1bc   : > { %v1456_v62 = vadd.bf16 %v3715_v32, %v1416_v59  ;;  %v1489_v2 = vmax.bf16 %v3390_v57, %v1457_v60 }
 0x1bd   : > { %v1205_v63 = vpop.f32.mrf.mxu1 }
 0x1be   : > { %v1488_v0 = vmax.bf16 %v3390_v57, %v1456_v62 }
 0x1bf   : > { %v3138_v1 = vpop.f32.mrf.mxu1 }
 0x1c0   : > { %v1419_v3 = vpack.c.bf16 %v3138_v1, %v3137_v61  ;;  %3211 = vmatprep.mubr.bf16.mxu0 %v1488_v0 }
 0x1c1   : > { %v1208_v4 = vpop.f32.mrf.mxu1  ;;  %3212 = vmatmul.mubr.bf16.gmra.mxu0 %v1489_v2 }
 0x1c2   : > { %v1418_v5 = vpack.c.bf16 %v1208_v4, %v1205_v63  ;;  %v1459_v6 = vadd.bf16 %v3715_v32, %v1419_v3 }
 0x1c3   : > { %v3141_v7 = vpop.f32.mrf.mxu1 }
 0x1c4   : > { %v1458_v8 = vadd.bf16 %v3715_v32, %v1418_v5  ;;  %v1491_v12 = vmax.bf16 %v3390_v57, %v1459_v6 }
 0x1c5   : > { %v1221_v9 = vpop.f32.mrf.mxu1 }
 0x1c6   : > { %v1490_v10 = vmax.bf16 %v3390_v57, %v1458_v8 }
 0x1c7   : > { %v3142_v11 = vpop.f32.mrf.mxu1 }
 0x1c8   : > { %v1421_v13 = vpack.c.bf16 %v3142_v11, %v3141_v7  ;;  %3215 = vmatprep.mubr.bf16.mxu0 %v1490_v10 }
 0x1c9   : > { %v1224_v14 = vpop.f32.mrf.mxu1  ;;  %3216 = vmatmul.mubr.bf16.gmra.mxu0 %v1491_v12 }
 0x1ca   : > { %v1420_v15 = vpack.c.bf16 %v1224_v14, %v1221_v9  ;;  %v1461_v16 = vadd.bf16 %v3715_v32, %v1421_v13  ;;  %v3380_v9 = vld [vmem:[%s4172_s7 + $0x8] sm:$0xff]  }
 0x1cb   : > { %v3145_v17 = vpop.f32.mrf.mxu1  ;;  %3271 = vmatprep.subr.bf16.mxu1 %v3380_v9 }
 0x1cc   : > { %v1460_v18 = vadd.bf16 %v3715_v32, %v1420_v15  ;;  %v1493_v22 = vmax.bf16 %v3390_v57, %v1461_v16  ;;  %3272 = vmatpush3.bf16.msra.mxu1 %v3380_v9  ;;  %v3381_v15 = vld [vmem:[%s4172_s7] sm:$0xff]  }
 0x1cd   : > { %v1237_v19 = vpop.f32.mrf.mxu1  ;;  %3273 = vmatprep.subr.bf16.mxu1 %v3381_v15 }
 0x1ce   : > { %v1492_v20 = vmax.bf16 %v3390_v57, %v1460_v18 }
 0x1cf   : > { %v3146_v21 = vpop.f32.mrf.mxu1 }
 0x1d0   : > { %v1423_v23 = vpack.c.bf16 %v3146_v21, %v3145_v17  ;;  %3219 = vmatprep.mubr.bf16.mxu0 %v1492_v20  ;;  %3274 = vmatpush3.bf16.msra.mxu1 %v3381_v15 }
 0x1d1   : > { %v1240_v24 = vpop.f32.mrf.mxu1  ;;  %3220 = vmatmul.mubr.bf16.gmra.mxu0 %v1493_v22 }
 0x1d2   : > { %v1422_v25 = vpack.c.bf16 %v1240_v24, %v1237_v19  ;;  %v1463_v26 = vadd.bf16 %v3715_v32, %v1423_v23 }
 0x1d3   : > { %v3149_v27 = vpop.f32.mrf.mxu1 }
 0x1d4   : > { %v1462_v28 = vadd.bf16 %v3715_v32, %v1422_v25  ;;  %v1495_v46 = vmax.bf16 %v3390_v57, %v1463_v26 }
 0x1d5   : > { %v1253_v29 = vpop.f32.mrf.mxu1 }
 0x1d6   : > { %v1494_v30 = vmax.bf16 %v3390_v57, %v1462_v28 }
 0x1d7   : > { %v3150_v31 = vpop.f32.mrf.mxu1 }
 0x1d8   : > { %v1425_v33 = vpack.c.bf16 %v3150_v31, %v3149_v27  ;;  %3223 = vmatprep.mubr.bf16.mxu0 %v1494_v30 }
 0x1d9   : > { %v1256_v34 = vpop.f32.mrf.mxu1  ;;  %3224 = vmatmul.mubr.bf16.gmra.mxu0 %v1495_v46 }
 0x1da   : > { %v1424_v35 = vpack.c.bf16 %v1256_v34, %v1253_v29  ;;  %v1465_v36 = vadd.bf16 %v3715_v32, %v1425_v33 }
 0x1db   : > { %v3153_v37 = vpop.f32.mrf.mxu1 }
 0x1dc   : > { %v1464_v38 = vadd.bf16 %v3715_v32, %v1424_v35  ;;  %v1497_v42 = vmax.bf16 %v3390_v57, %v1465_v36 }
 0x1dd   : > { %v1269_v39 = vpop.f32.mrf.mxu1 }
 0x1de   : > { %v1496_v40 = vmax.bf16 %v3390_v57, %v1464_v38 }
 0x1df   : > { %v3154_v41 = vpop.f32.mrf.mxu1 }
 0x1e0   : > { %v1427_v44 = vpack.c.bf16 %v3154_v41, %v3153_v37  ;;  %3227 = vmatprep.mubr.bf16.mxu0 %v1496_v40 }
 0x1e1   : > { %v1272_v45 = vpop.f32.mrf.mxu1  ;;  %3228 = vmatmul.mubr.bf16.gmra.mxu0 %v1497_v42 }
 0x1e2   : > { %v1426_v47 = vpack.c.bf16 %v1272_v45, %v1269_v39  ;;  %v1467_v48 = vadd.bf16 %v3715_v32, %v1427_v44 }
 0x1e3   : > { %v3157_v49 = vpop.f32.mrf.mxu1 }
 0x1e4   : > { %v1466_v50 = vadd.bf16 %v3715_v32, %v1426_v47  ;;  %v1499_v54 = vmax.bf16 %v3390_v57, %v1467_v48 }
 0x1e5   : > { %v1285_v51 = vpop.f32.mrf.mxu1 }
 0x1e6   : > { %v1498_v52 = vmax.bf16 %v3390_v57, %v1466_v50 }
 0x1e7   : > { %v3158_v53 = vpop.f32.mrf.mxu1 }
 0x1e8   : > { %v1429_v55 = vpack.c.bf16 %v3158_v53, %v3157_v49  ;;  %3231 = vmatprep.mubr.bf16.mxu0 %v1498_v52 }
 0x1e9   : > { %v1288_v56 = vpop.f32.mrf.mxu1  ;;  %3232 = vmatmul.mubr.bf16.gmra.mxu0 %v1499_v54 }
 0x1ea   : > { %v1428_v58 = vpack.c.bf16 %v1288_v56, %v1285_v51  ;;  %v1469_v59 = vadd.bf16 %v3715_v32, %v1429_v55 }
 0x1eb   : > { %v3161_v60 = vpop.f32.mrf.mxu1 }
 0x1ec   : > { %v1468_v61 = vadd.bf16 %v3715_v32, %v1428_v58  ;;  %v1501_v1 = vmax.bf16 %v3390_v57, %v1469_v59 }
 0x1ed   : > { %v1301_v62 = vpop.f32.mrf.mxu1 }
 0x1ee   : > { %v1500_v63 = vmax.bf16 %v3390_v57, %v1468_v61 }
 0x1ef   : > { %v3162_v0 = vpop.f32.mrf.mxu1 }
 0x1f0   : > { %v1431_v2 = vpack.c.bf16 %v3162_v0, %v3161_v60  ;;  %3235 = vmatprep.mubr.bf16.mxu0 %v1500_v63 }
 0x1f1   : > { %v1304_v3 = vpop.f32.mrf.mxu1  ;;  %3236 = vmatmul.mubr.bf16.gmra.mxu0 %v1501_v1 }
 0x1f2   : > { %v1430_v4 = vpack.c.bf16 %v1304_v3, %v1301_v62  ;;  %v1471_v5 = vadd.bf16 %v3715_v32, %v1431_v2 }
 0x1f3   : > { %v3165_v6 = vpop.f32.mrf.mxu1 }
 0x1f4   : > { %v1470_v7 = vadd.bf16 %v3715_v32, %v1430_v4  ;;  %v1503_v12 = vmax.bf16 %v3390_v57, %v1471_v5 }
 0x1f5   : > { %v1317_v8 = vpop.f32.mrf.mxu1 }
 0x1f6   : > { %v1502_v10 = vmax.bf16 %v3390_v57, %v1470_v7 }
 0x1f7   : > { %v3166_v11 = vpop.f32.mrf.mxu1 }
 0x1f8   : > { %v1433_v13 = vpack.c.bf16 %v3166_v11, %v3165_v6  ;;  %3239 = vmatprep.mubr.bf16.mxu0 %v1502_v10  ;;  %v1901_v10 = vld [vmem:[%s4171_s6] sm:$0x1] }
 0x1f9   : > { %v1320_v14 = vpop.f32.mrf.mxu1  ;;  %3240 = vmatmul.mubr.bf16.gmra.mxu0 %v1503_v12  ;;  %v1903_v12 = vpack.i.b16 %v1901_v10, %v1901_v10 }
 0x1fa   : > { %v1432_v16 = vpack.c.bf16 %v1320_v14, %v1317_v8  ;;  %v1473_v17 = vadd.bf16 %v3715_v32, %v1433_v13 }
 0x1fb   : > { %v3169_v18 = vpop.f32.mrf.mxu1  ;;  %v3797_v15 = vrot.slane %v1903_v12, %v3586_v43 }
 0x1fc   : > { %v1472_v19 = vadd.bf16 %v3715_v32, %v1432_v16  ;;  %v1505_v23 = vmax.bf16 %v3390_v57, %v1473_v17 }
 0x1fd   : > { %v1333_v20 = vpop.f32.mrf.mxu1 }
 0x1fe   : > { %v1504_v21 = vmax.bf16 %v3390_v57, %v1472_v19 }
 0x1ff   : > { %v3170_v22 = vpop.f32.mrf.mxu1 }
 0x200   : > { %v1435_v24 = vpack.c.bf16 %v3170_v22, %v3169_v18  ;;  %3243 = vmatprep.mubr.bf16.mxu0 %v1504_v21 }
 0x201   : > { %v1336_v25 = vpop.f32.mrf.mxu1  ;;  %3244 = vmatmul.mubr.bf16.gmra.mxu0 %v1505_v23 }
 0x202   : > { %v1434_v26 = vpack.c.bf16 %v1336_v25, %v1333_v20  ;;  %v1475_v27 = vadd.bf16 %v3715_v32, %v1435_v24 }
 0x203   : > { %v3173_v28 = vpop.f32.mrf.mxu1 }
 0x204   : > { %v1474_v29 = vadd.bf16 %v3715_v32, %v1434_v26  ;;  %v1507_v33 = vmax.bf16 %v3390_v57, %v1475_v27 }
 0x205   : > { %v1349_v30 = vpop.f32.mrf.mxu1 }
 0x206   : > { %v1506_v31 = vmax.bf16 %v3390_v57, %v1474_v29 }
 0x207   : > { %v3174_v46 = vpop.f32.mrf.mxu1 }
 0x208   : > { %v1437_v34 = vpack.c.bf16 %v3174_v46, %v3173_v28  ;;  %3247 = vmatprep.mubr.bf16.mxu0 %v1506_v31 }
 0x209   : > { %v1352_v35 = vpop.f32.mrf.mxu1  ;;  %3248 = vmatmul.mubr.bf16.gmra.mxu0 %v1507_v33 }
 0x20a   : > { %v1436_v36 = vpack.c.bf16 %v1352_v35, %v1349_v30  ;;  %v1477_v37 = vadd.bf16 %v3715_v32, %v1437_v34 }
 0x20b   : > { %v3177_v38 = vpop.f32.mrf.mxu1 }
 0x20c   : > { %v1476_v39 = vadd.bf16 %v3715_v32, %v1436_v36  ;;  %v1509_v42 = vmax.bf16 %v3390_v57, %v1477_v37 }
 0x20d   : > { %v1365_v40 = vpop.f32.mrf.mxu1 }
 0x20e   : > { %v1508_v41 = vmax.bf16 %v3390_v57, %v1476_v39 }
 0x20f   : > { %v3178_v44 = vpop.f32.mrf.mxu1 }
 0x210   : > { %v1439_v45 = vpack.c.bf16 %v3178_v44, %v3177_v38  ;;  %3251 = vmatprep.mubr.bf16.mxu0 %v1508_v41 }
 0x211   : > { %v1368_v47 = vpop.f32.mrf.mxu1  ;;  %3252 = vmatmul.mubr.bf16.gmra.mxu0 %v1509_v42 }
 0x212   : > { %v1438_v48 = vpack.c.bf16 %v1368_v47, %v1365_v40  ;;  %v1479_v49 = vadd.bf16 %v3715_v32, %v1439_v45 }
 0x213   : > { %v3181_v50 = vpop.f32.mrf.mxu1 }
 0x214   : > { %v1478_v51 = vadd.bf16 %v3715_v32, %v1438_v48  ;;  %v1511_v54 = vmax.bf16 %v3390_v57, %v1479_v49 }
 0x215   : > { %v1381_v52 = vpop.f32.mrf.mxu1 }
 0x216   : > { %v1510_v53 = vmax.bf16 %v3390_v57, %v1478_v51 }
 0x217   : > { %v3182_v55 = vpop.f32.mrf.mxu1 }
 0x218   : > { %v1441_v56 = vpack.c.bf16 %v3182_v55, %v3181_v50  ;;  %3255 = vmatprep.mubr.bf16.mxu0 %v1510_v53 }
 0x219   : > { %v1384_v58 = vpop.f32.mrf.mxu1  ;;  %3256 = vmatmul.mubr.bf16.gmra.mxu0 %v1511_v54 }
 0x21a   : > { %v1440_v59 = vpack.c.bf16 %v1384_v58, %v1381_v52  ;;  %v1481_v60 = vadd.bf16 %v3715_v32, %v1441_v56 }
 0x21b   : > { %v3185_v61 = vpop.f32.mrf.mxu1 }
 0x21c   : > { %v1480_v62 = vadd.bf16 %v3715_v32, %v1440_v59  ;;  %v1513_v1 = vmax.bf16 %v3390_v57, %v1481_v60 }
 0x21d   : > { %v1397_v63 = vpop.f32.mrf.mxu1 }
 0x21e   : > { %v1512_v0 = vmax.bf16 %v3390_v57, %v1480_v62 }
 0x21f   : > { %v3186_v2 = vpop.f32.mrf.mxu1 }
 0x220   : > { %v1443_v3 = vpack.c.bf16 %v3186_v2, %v3185_v61  ;;  %3259 = vmatprep.mubr.bf16.mxu0 %v1512_v0 }
 0x221   : > { %v1400_v4 = vpop.f32.mrf.mxu1  ;;  %3260 = vmatmul.mubr.bf16.gmra.mxu0 %v1513_v1 }
 0x222   : > { %v1442_v5 = vpack.c.bf16 %v1400_v4, %v1397_v63  ;;  %v1483_v6 = vadd.bf16 %v3715_v32, %v1443_v3 }
 0x224   : > { %v1482_v7 = vadd.bf16 %v3715_v32, %v1442_v5  ;;  %v1515_v9 = vmax.bf16 %v3390_v57, %v1483_v6 }
 0x226   : > { %v1514_v8 = vmax.bf16 %v3390_v57, %v1482_v7 }
 0x228   : > { %3263 = vmatprep.mubr.bf16.mxu0 %v1514_v8 }
 0x229   : > { %3264 = vmatmul.mubr.bf16.gmra.mxu0 %v1515_v9 }
 0x271   : > { %v3205_v11 = vpop.f32.mrf.mxu0 }
 0x273   : > { %v1614_v13 = vpop.f32.mrf.mxu0 }
 0x275   : > { %v3206_v14 = vpop.f32.mrf.mxu0 }
 0x276   : > { %v1870_v16 = vpack.c.bf16 %v3206_v14, %v3205_v11 }
 0x277   : > { %v1617_v17 = vpop.f32.mrf.mxu0 }
 0x278   : > { %v1869_v32 = vpack.c.bf16 %v1617_v17, %v1614_v13  ;;  %v1910_v18 = vadd.bf16 %v3797_v15, %v1870_v16 }
 0x279   : > { %v3209_v19 = vpop.f32.mrf.mxu0 }
 0x27a   : > { %v1909_v20 = vadd.bf16 %v3797_v15, %v1869_v32  ;;  %v1942_v23 = vmax.bf16 %v3390_v57, %v1910_v18 }
 0x27b   : > { %v1630_v21 = vpop.f32.mrf.mxu0 }
 0x27c   : > { %v1941_v22 = vmax.bf16 %v3390_v57, %v1909_v20 }
 0x27d   : > { %v3210_v24 = vpop.f32.mrf.mxu0 }
 0x27e   : > { %v1872_v25 = vpack.c.bf16 %v3210_v24, %v3209_v19  ;;  %3275 = vmatprep.mubr.msk.bf16.mxu1 %vm1026_vm1, %v1941_v22 }
 0x27f   : > { %v1633_v26 = vpop.f32.mrf.mxu0  ;;  %3276 = vmatmul.mubr.msk.bf16.vlgmr.msra.gmra.mxu1 %vm1026_vm1, %v1942_v23 }
 0x280   : > { %v1871_v27 = vpack.c.bf16 %v1633_v26, %v1630_v21  ;;  %v1912_v28 = vadd.bf16 %v3797_v15, %v1872_v25 }
 0x281   : > { %v3213_v29 = vpop.f32.mrf.mxu0 }
 0x282   : > { %v1911_v30 = vadd.bf16 %v3797_v15, %v1871_v27  ;;  %v1944_v33 = vmax.bf16 %v3390_v57, %v1912_v28 }
 0x283   : > { %v1646_v31 = vpop.f32.mrf.mxu0 }
 0x284   : > { %v1943_v46 = vmax.bf16 %v3390_v57, %v1911_v30 }
 0x285   : > { %v3214_v34 = vpop.f32.mrf.mxu0 }
 0x286   : > { %v1874_v35 = vpack.c.bf16 %v3214_v34, %v3213_v29  ;;  %3279 = vmatprep.mubr.msk.bf16.mxu1 %vm1026_vm1, %v1943_v46 }
 0x287   : > { %v1649_v36 = vpop.f32.mrf.mxu0  ;;  %3280 = vmatmul.mubr.msk.bf16.gmra.mxu1 %vm1026_vm1, %v1944_v33 }
 0x288   : > { %v1873_v37 = vpack.c.bf16 %v1649_v36, %v1646_v31  ;;  %v1914_v38 = vadd.bf16 %v3797_v15, %v1874_v35 }
 0x289   : > { %v3217_v39 = vpop.f32.mrf.mxu0 }
 0x28a   : > { %v1913_v40 = vadd.bf16 %v3797_v15, %v1873_v37  ;;  %v1946_v44 = vmax.bf16 %v3390_v57, %v1914_v38 }
 0x28b   : > { %v1662_v41 = vpop.f32.mrf.mxu0 }
 0x28c   : > { %v1945_v42 = vmax.bf16 %v3390_v57, %v1913_v40 }
 0x28d   : > { %v3218_v45 = vpop.f32.mrf.mxu0 }
 0x28e   : > { %v1876_v47 = vpack.c.bf16 %v3218_v45, %v3217_v39  ;;  %3283 = vmatprep.mubr.msk.bf16.mxu1 %vm1026_vm1, %v1945_v42 }
 0x28f   : > { %v1665_v48 = vpop.f32.mrf.mxu0  ;;  %3284 = vmatmul.mubr.msk.bf16.gmra.mxu1 %vm1026_vm1, %v1946_v44 }
 0x290   : > { %v1875_v49 = vpack.c.bf16 %v1665_v48, %v1662_v41  ;;  %v1916_v50 = vadd.bf16 %v3797_v15, %v1876_v47 }
 0x291   : > { %v3221_v51 = vpop.f32.mrf.mxu0 }
 0x292   : > { %v1915_v52 = vadd.bf16 %v3797_v15, %v1875_v49  ;;  %v1948_v55 = vmax.bf16 %v3390_v57, %v1916_v50 }
 0x293   : > { %v1678_v53 = vpop.f32.mrf.mxu0 }
 0x294   : > { %v1947_v54 = vmax.bf16 %v3390_v57, %v1915_v52 }
 0x295   : > { %v3222_v56 = vpop.f32.mrf.mxu0 }
 0x296   : > { %v1878_v58 = vpack.c.bf16 %v3222_v56, %v3221_v51  ;;  %3287 = vmatprep.mubr.msk.bf16.mxu1 %vm1026_vm1, %v1947_v54 }
 0x297   : > { %v1681_v59 = vpop.f32.mrf.mxu0  ;;  %3288 = vmatmul.mubr.msk.bf16.gmra.mxu1 %vm1026_vm1, %v1948_v55 }
 0x298   : > { %v1877_v60 = vpack.c.bf16 %v1681_v59, %v1678_v53  ;;  %v1918_v61 = vadd.bf16 %v3797_v15, %v1878_v58 }
 0x299   : > { %v3225_v62 = vpop.f32.mrf.mxu0 }
 0x29a   : > { %v1917_v63 = vadd.bf16 %v3797_v15, %v1877_v60  ;;  %v1950_v2 = vmax.bf16 %v3390_v57, %v1918_v61 }
 0x29b   : > { %v1694_v0 = vpop.f32.mrf.mxu0 }
 0x29c   : > { %v1949_v1 = vmax.bf16 %v3390_v57, %v1917_v63 }
 0x29d   : > { %v3226_v3 = vpop.f32.mrf.mxu0 }
 0x29e   : > { %v1880_v4 = vpack.c.bf16 %v3226_v3, %v3225_v62  ;;  %3291 = vmatprep.mubr.msk.bf16.mxu1 %vm1026_vm1, %v1949_v1 }
 0x29f   : > { %v1697_v5 = vpop.f32.mrf.mxu0  ;;  %3292 = vmatmul.mubr.msk.bf16.gmra.mxu1 %vm1026_vm1, %v1950_v2 }
 0x2a0   : > { %v1879_v6 = vpack.c.bf16 %v1697_v5, %v1694_v0  ;;  %v1920_v7 = vadd.bf16 %v3797_v15, %v1880_v4 }
 0x2a1   : > { %v3229_v8 = vpop.f32.mrf.mxu0 }
 0x2a2   : > { %v1919_v9 = vadd.bf16 %v3797_v15, %v1879_v6  ;;  %v1952_v12 = vmax.bf16 %v3390_v57, %v1920_v7 }
 0x2a3   : > { %v1710_v10 = vpop.f32.mrf.mxu0 }
 0x2a4   : > { %v1951_v11 = vmax.bf16 %v3390_v57, %v1919_v9 }
 0x2a5   : > { %v3230_v13 = vpop.f32.mrf.mxu0 }
 0x2a6   : > { %v1882_v14 = vpack.c.bf16 %v3230_v13, %v3229_v8  ;;  %3295 = vmatprep.mubr.msk.bf16.mxu1 %vm1026_vm1, %v1951_v11 }
 0x2a7   : > { %v1713_v16 = vpop.f32.mrf.mxu0  ;;  %3296 = vmatmul.mubr.msk.bf16.gmra.mxu1 %vm1026_vm1, %v1952_v12 }
 0x2a8   : > { %v1881_v17 = vpack.c.bf16 %v1713_v16, %v1710_v10  ;;  %v1922_v32 = vadd.bf16 %v3797_v15, %v1882_v14 }
 0x2a9   : > { %v3233_v18 = vpop.f32.mrf.mxu0 }
 0x2aa   : > { %v1921_v19 = vadd.bf16 %v3797_v15, %v1881_v17  ;;  %v1954_v22 = vmax.bf16 %v3390_v57, %v1922_v32 }
 0x2ab   : > { %v1726_v20 = vpop.f32.mrf.mxu0 }
 0x2ac   : > { %v1953_v21 = vmax.bf16 %v3390_v57, %v1921_v19 }
 0x2ad   : > { %v3234_v23 = vpop.f32.mrf.mxu0 }
 0x2ae   : > { %v1884_v24 = vpack.c.bf16 %v3234_v23, %v3233_v18  ;;  %3299 = vmatprep.mubr.msk.bf16.mxu1 %vm1026_vm1, %v1953_v21 }
 0x2af   : > { %v1729_v25 = vpop.f32.mrf.mxu0  ;;  %3300 = vmatmul.mubr.msk.bf16.gmra.mxu1 %vm1026_vm1, %v1954_v22 }
 0x2b0   : > { %v1883_v26 = vpack.c.bf16 %v1729_v25, %v1726_v20  ;;  %v1924_v27 = vadd.bf16 %v3797_v15, %v1884_v24 }
 0x2b1   : > { %v3237_v28 = vpop.f32.mrf.mxu0 }
 0x2b2   : > { %v1923_v29 = vadd.bf16 %v3797_v15, %v1883_v26  ;;  %v1956_v46 = vmax.bf16 %v3390_v57, %v1924_v27 }
 0x2b3   : > { %v1742_v30 = vpop.f32.mrf.mxu0 }
 0x2b4   : > { %v1955_v31 = vmax.bf16 %v3390_v57, %v1923_v29 }
 0x2b5   : > { %v3238_v33 = vpop.f32.mrf.mxu0 }
 0x2b6   : > { %v1886_v34 = vpack.c.bf16 %v3238_v33, %v3237_v28  ;;  %3303 = vmatprep.mubr.msk.bf16.mxu1 %vm1026_vm1, %v1955_v31 }
 0x2b7   : > { %v1745_v35 = vpop.f32.mrf.mxu0  ;;  %3304 = vmatmul.mubr.msk.bf16.gmra.mxu1 %vm1026_vm1, %v1956_v46 }
 0x2b8   : > { %v1885_v36 = vpack.c.bf16 %v1745_v35, %v1742_v30  ;;  %v1926_v37 = vadd.bf16 %v3797_v15, %v1886_v34 }
 0x2b9   : > { %v3241_v38 = vpop.f32.mrf.mxu0 }
 0x2ba   : > { %v1925_v39 = vadd.bf16 %v3797_v15, %v1885_v36  ;;  %v1958_v42 = vmax.bf16 %v3390_v57, %v1926_v37 }
 0x2bb   : > { %v1758_v40 = vpop.f32.mrf.mxu0 }
 0x2bc   : > { %v1957_v41 = vmax.bf16 %v3390_v57, %v1925_v39 }
 0x2bd   : > { %v3242_v44 = vpop.f32.mrf.mxu0 }
 0x2be   : > { %v1888_v45 = vpack.c.bf16 %v3242_v44, %v3241_v38  ;;  %3307 = vmatprep.mubr.msk.bf16.mxu1 %vm1026_vm1, %v1957_v41 }
 0x2bf   : > { %v1761_v47 = vpop.f32.mrf.mxu0  ;;  %3308 = vmatmul.mubr.msk.bf16.gmra.mxu1 %vm1026_vm1, %v1958_v42 }
 0x2c0   : > { %v1887_v48 = vpack.c.bf16 %v1761_v47, %v1758_v40  ;;  %v1928_v49 = vadd.bf16 %v3797_v15, %v1888_v45 }
 0x2c1   : > { %v3245_v50 = vpop.f32.mrf.mxu0 }
 0x2c2   : > { %v1927_v51 = vadd.bf16 %v3797_v15, %v1887_v48  ;;  %v1960_v54 = vmax.bf16 %v3390_v57, %v1928_v49 }
 0x2c3   : > { %v1774_v52 = vpop.f32.mrf.mxu0 }
 0x2c4   : > { %v1959_v53 = vmax.bf16 %v3390_v57, %v1927_v51 }
 0x2c5   : > { %v3246_v55 = vpop.f32.mrf.mxu0 }
 0x2c6   : > { %v1890_v56 = vpack.c.bf16 %v3246_v55, %v3245_v50  ;;  %3311 = vmatprep.mubr.msk.bf16.mxu1 %vm1026_vm1, %v1959_v53 }
 0x2c7   : > { %v1777_v58 = vpop.f32.mrf.mxu0  ;;  %3312 = vmatmul.mubr.msk.bf16.gmra.mxu1 %vm1026_vm1, %v1960_v54 }
 0x2c8   : > { %v1889_v59 = vpack.c.bf16 %v1777_v58, %v1774_v52  ;;  %v1930_v60 = vadd.bf16 %v3797_v15, %v1890_v56 }
 0x2c9   : > { %v3249_v61 = vpop.f32.mrf.mxu0 }
 0x2ca   : > { %v1929_v62 = vadd.bf16 %v3797_v15, %v1889_v59  ;;  %v1962_v1 = vmax.bf16 %v3390_v57, %v1930_v60 }
 0x2cb   : > { %v1790_v63 = vpop.f32.mrf.mxu0 }
 0x2cc   : > { %v1961_v0 = vmax.bf16 %v3390_v57, %v1929_v62 }
 0x2cd   : > { %v3250_v2 = vpop.f32.mrf.mxu0 }
 0x2ce   : > { %v1892_v3 = vpack.c.bf16 %v3250_v2, %v3249_v61  ;;  %3315 = vmatprep.mubr.msk.bf16.mxu1 %vm1026_vm1, %v1961_v0 }
 0x2cf   : > { %v1793_v4 = vpop.f32.mrf.mxu0  ;;  %3316 = vmatmul.mubr.msk.bf16.gmra.mxu1 %vm1026_vm1, %v1962_v1 }
 0x2d0   : > { %v1891_v5 = vpack.c.bf16 %v1793_v4, %v1790_v63  ;;  %v1932_v6 = vadd.bf16 %v3797_v15, %v1892_v3 }
 0x2d1   : > { %v3253_v7 = vpop.f32.mrf.mxu0 }
 0x2d2   : > { %v1931_v8 = vadd.bf16 %v3797_v15, %v1891_v5  ;;  %v1964_v11 = vmax.bf16 %v3390_v57, %v1932_v6 }
 0x2d3   : > { %v1806_v9 = vpop.f32.mrf.mxu0 }
 0x2d4   : > { %v1963_v10 = vmax.bf16 %v3390_v57, %v1931_v8 }
 0x2d5   : > { %v3254_v12 = vpop.f32.mrf.mxu0 }
 0x2d6   : > { %v1894_v13 = vpack.c.bf16 %v3254_v12, %v3253_v7  ;;  %3319 = vmatprep.mubr.msk.bf16.mxu1 %vm1026_vm1, %v1963_v10 }
 0x2d7   : > { %v1809_v14 = vpop.f32.mrf.mxu0  ;;  %3320 = vmatmul.mubr.msk.bf16.gmra.mxu1 %vm1026_vm1, %v1964_v11 }
 0x2d8   : > { %v1893_v16 = vpack.c.bf16 %v1809_v14, %v1806_v9  ;;  %v1934_v17 = vadd.bf16 %v3797_v15, %v1894_v13 }
 0x2d9   : > { %v3257_v32 = vpop.f32.mrf.mxu0 }
 0x2da   : > { %v1933_v18 = vadd.bf16 %v3797_v15, %v1893_v16  ;;  %v1966_v21 = vmax.bf16 %v3390_v57, %v1934_v17 }
 0x2db   : > { %v1822_v19 = vpop.f32.mrf.mxu0 }
 0x2dc   : > { %v1965_v20 = vmax.bf16 %v3390_v57, %v1933_v18 }
 0x2dd   : > { %v3258_v22 = vpop.f32.mrf.mxu0 }
 0x2de   : > { %v1896_v23 = vpack.c.bf16 %v3258_v22, %v3257_v32  ;;  %3323 = vmatprep.mubr.msk.bf16.mxu1 %vm1026_vm1, %v1965_v20 }
 0x2df   : > { %v1825_v24 = vpop.f32.mrf.mxu0  ;;  %3324 = vmatmul.mubr.msk.bf16.gmra.mxu1 %vm1026_vm1, %v1966_v21 }
 0x2e0   : > { %v1895_v25 = vpack.c.bf16 %v1825_v24, %v1822_v19  ;;  %v1936_v26 = vadd.bf16 %v3797_v15, %v1896_v23  ;;  %v2422_v19 = vld [vmem:[%s4173_s8] sm:$0x1] }
 0x2e1   : > { %v3261_v27 = vpop.f32.mrf.mxu0  ;;  %v2424_v22 = vpack.i.b16 %v2422_v19, %v2422_v19 }
 0x2e2   : > { %v1935_v28 = vadd.bf16 %v3797_v15, %v1895_v25  ;;  %v1968_v31 = vmax.bf16 %v3390_v57, %v1936_v26 }
 0x2e3   : > { %v1838_v29 = vpop.f32.mrf.mxu0  ;;  %v3947_v26 = vrot.slane %v2424_v22, %v3586_v43 }
 0x2e4   : > { %v1967_v30 = vmax.bf16 %v3390_v57, %v1935_v28  ;;  %v3952_v28 = vld [vmem:[%s4174_s9] sm:$0xf] }
 0x2e5   : > { %v3262_v46 = vpop.f32.mrf.mxu0  ;;  %3027 = vmatprep.mubr.msk.bf16.mxu0 %vm504_vm0, %v3952_v28 }
 0x2e6   : > { %v1898_v33 = vpack.c.bf16 %v3262_v46, %v3261_v27  ;;  %3327 = vmatprep.mubr.msk.bf16.mxu1 %vm1026_vm1, %v1967_v30 }
 0x2e7   : > { %v1841_v34 = vpop.f32.mrf.mxu0  ;;  %3328 = vmatmul.mubr.msk.bf16.gmra.mxu1 %vm1026_vm1, %v1968_v31 }
 0x2e8   : > { %v1897_v35 = vpack.c.bf16 %v1841_v34, %v1838_v29  ;;  %v1938_v36 = vadd.bf16 %v3797_v15, %v1898_v33 }
 0x2e9   : > { %v3265_v37 = vpop.f32.mrf.mxu0 }
 0x2ea   : > { %v1937_v38 = vadd.bf16 %v3797_v15, %v1897_v35  ;;  %v1970_v41 = vmax.bf16 %v3390_v57, %v1938_v36 }
 0x2eb   : > { %v1854_v39 = vpop.f32.mrf.mxu0 }
 0x2ec   : > { %v1969_v40 = vmax.bf16 %v3390_v57, %v1937_v38 }
 0x2ed   : > { %v3266_v42 = vpop.f32.mrf.mxu0 }
 0x2ee   : > { %v1900_v44 = vpack.c.bf16 %v3266_v42, %v3265_v37  ;;  %3331 = vmatprep.mubr.msk.bf16.mxu1 %vm1026_vm1, %v1969_v40 }
 0x2ef   : > { %v1857_v45 = vpop.f32.mrf.mxu0  ;;  %3332 = vmatmul.mubr.msk.bf16.gmra.mxu1 %vm1026_vm1, %v1970_v41 }
 0x2f0   : > { %v1899_v47 = vpack.c.bf16 %v1857_v45, %v1854_v39  ;;  %v1940_v48 = vadd.bf16 %v3797_v15, %v1900_v44 }
 0x2f2   : > { %v1939_v49 = vadd.bf16 %v3797_v15, %v1899_v47  ;;  %v1972_v51 = vmax.bf16 %v3390_v57, %v1940_v48 }
 0x2f4   : > { %v1971_v50 = vmax.bf16 %v3390_v57, %v1939_v49 }
 0x2f6   : > { %3335 = vmatprep.mubr.msk.bf16.mxu1 %vm1026_vm1, %v1971_v50 }
 0x2f7   : > { %3336 = vmatmul.mubr.msk.bf16.gmra.mxu1 %vm1026_vm1, %v1972_v51 }
 0x2f8   : > { %3045 = vmatprep.mubr.msk.bf16.mxu1 %vm504_vm0, %v3952_v28 }
 0x33f   : > { %v3895_v52 = vpop.f32.mrf.mxu1 }
 0x341   : > { %v3897_v53 = vpop.f32.mrf.mxu1 }
 0x343   : > { %v3899_v54 = vpop.f32.mrf.mxu1 }
 0x344   : > { %v2391_v55 = vpack.c.bf16 %v3899_v54, %v3895_v52 }
 0x345   : > { %v3903_v56 = vpop.f32.mrf.mxu1 }
 0x346   : > { %v2390_v15 = vpack.c.bf16 %v3903_v56, %v3897_v53 }
 0x347   : > { %v3907_v58 = vpop.f32.mrf.mxu1 }
 0x349   : > { %v3909_v59 = vpop.f32.mrf.mxu1 }
 0x34b   : > { %v3911_v60 = vpop.f32.mrf.mxu1 }
 0x34c   : > { %v2393_v61 = vpack.c.bf16 %v3911_v60, %v3907_v58 }
 0x34d   : > { %v3915_v62 = vpop.f32.mrf.mxu1 }
 0x34e   : > { %v2392_v63 = vpack.c.bf16 %v3915_v62, %v3909_v59 }
 0x34f   : > { %v3285_v0 = vpop.f32.mrf.mxu1 }
 0x350   : > { %v2432_v60 = vadd.bf16 %v3947_v26, %v2392_v63 }
 0x351   : > { %v3919_v1 = vpop.f32.mrf.mxu1 }
 0x353   : > { %v3286_v2 = vpop.f32.mrf.mxu1 }
 0x354   : > { %v2395_v49 = vpack.c.bf16 %v3286_v2, %v3285_v0 }
 0x355   : > { %v3921_v3 = vpop.f32.mrf.mxu1 }
 0x357   : > { %v3289_v4 = vpop.f32.mrf.mxu1 }
 0x359   : > { %v2183_v5 = vpop.f32.mrf.mxu1 }
 0x35b   : > { %v3290_v6 = vpop.f32.mrf.mxu1 }
 0x35c   : > { %v2397_v24 = vpack.c.bf16 %v3290_v6, %v3289_v4 }
 0x35d   : > { %v2186_v7 = vpop.f32.mrf.mxu1 }
 0x35e   : > { %v2437_v29 = vadd.bf16 %v3947_v26, %v2397_v24  ;;  %v2396_v33 = vpack.c.bf16 %v2186_v7, %v2183_v5  ;;  %v2435_v7 = vadd.bf16 %v3947_v26, %v2395_v49 }
 0x35f   : > { %v3923_v8 = vpop.f32.mrf.mxu1 }
 0x360   : > { %v2469_v43 = vmax.bf16 %v3390_v57, %v2437_v29  ;;  %v2436_v40 = vadd.bf16 %v3947_v26, %v2396_v33  ;;  %v2467_v24 = vmax.bf16 %v3390_v57, %v2435_v7 }
 0x361   : > { %v3925_v9 = vpop.f32.mrf.mxu1 }
 0x362   : > { %v2522_v44 = vsel %vm504_vm0, %v2469_v43, 0  ;;  %v2468_v50 = vmax.bf16 %v3390_v57, %v2436_v40  ;;  %v2516_v43 = vsel %vm504_vm0, %v2467_v24, 0 }
 0x363   : > { %v3927_v10 = vpop.f32.mrf.mxu1 }
 0x364   : > { %v2399_v11 = vpack.c.bf16 %v3927_v10, %v3923_v8 }
 0x365   : > { %v3931_v12 = vpop.f32.mrf.mxu1 }
 0x366   : > { %v2398_v13 = vpack.c.bf16 %v3931_v12, %v3925_v9  ;;  %v2439_v59 = vadd.bf16 %v3947_v26, %v2399_v11 }
 0x367   : > { %v3935_v14 = vpop.f32.mrf.mxu1 }
 0x368   : > { %v2471_v24 = vmax.bf16 %v3390_v57, %v2439_v59  ;;  %v2438_v11 = vadd.bf16 %v3947_v26, %v2398_v13 }
 0x369   : > { %v3937_v16 = vpop.f32.mrf.mxu1 }
 0x36b   : > { %v3939_v17 = vpop.f32.mrf.mxu1 }
 0x36d   : > { %v3941_v32 = vpop.f32.mrf.mxu1 }
 0x36f   : > { %v3301_v18 = vpop.f32.mrf.mxu1 }
 0x371   : > { %v2231_v20 = vpop.f32.mrf.mxu1 }
 0x373   : > { %v3302_v21 = vpop.f32.mrf.mxu1 }
 0x374   : > { %v2403_v41 = vpack.c.bf16 %v3302_v21, %v3301_v18  ;;  %v2519_v21 = vsel %vm504_vm0, %v2468_v50, 0 }
 0x375   : > { %v2234_v23 = vpop.f32.mrf.mxu1 }
 0x376   : > { %v2443_v51 = vadd.bf16 %v3947_v26, %v2403_v41  ;;  %v2402_v19 = vpack.c.bf16 %v2234_v23, %v2231_v20 }
 0x377   : > { %v3305_v25 = vpop.f32.mrf.mxu1 }
 0x378   : > { %v2475_v18 = vmax.bf16 %v3390_v57, %v2443_v51 }
 0x379   : > { %v2247_v27 = vpop.f32.mrf.mxu1 }
 0x37b   : > { %v3306_v30 = vpop.f32.mrf.mxu1 }
 0x37c   : > { %v2405_v31 = vpack.c.bf16 %v3306_v30, %v3305_v25  ;;  %v2394_v25 = vpack.c.bf16 %v3921_v3, %v3919_v1 }
 0x37d   : > { %v2250_v46 = vpop.f32.mrf.mxu1 }
 0x37e   : > { %v2445_v34 = vadd.bf16 %v3947_v26, %v2405_v31  ;;  %v2404_v35 = vpack.c.bf16 %v2250_v46, %v2247_v27  ;;  %v2442_v27 = vadd.bf16 %v3947_v26, %v2402_v19  ;;  %v2434_v30 = vadd.bf16 %v3947_v26, %v2394_v25 }
 0x37f   : > { %v3961_v36 = vpop.f32.mrf.mxu1  ;;  %v2401_v31 = vpack.c.bf16 %v3939_v17, %v3935_v14  ;;  %v2433_v14 = vadd.bf16 %v3947_v26, %v2393_v61 }
 0x380   : > { %v2477_v37 = vmax.bf16 %v3390_v57, %v2445_v34  ;;  %v2444_v38 = vadd.bf16 %v3947_v26, %v2404_v35  ;;  %v2474_v46 = vmax.bf16 %v3390_v57, %v2442_v27  ;;  %v2466_v3 = vmax.bf16 %v3390_v57, %v2434_v30 }
 0x381   : > { %v3965_v39 = vpop.f32.mrf.mxu1  ;;  %v2441_v34 = vadd.bf16 %v3947_v26, %v2401_v31  ;;  %v2470_v30 = vmax.bf16 %v3390_v57, %v2438_v11 }
 0x382   : > { %v2476_v42 = vmax.bf16 %v3390_v57, %v2444_v38  ;;  %3339 = vmatprep.subr.msk.bf16.mxu0 %vm504_vm0, %v2477_v37  ;;  %v2400_v38 = vpack.c.bf16 %v3941_v32, %v3937_v16  ;;  %v2513_v40 = vsel %vm504_vm0, %v2466_v3, 0 }
 0x383   : > { %v3971_v45 = vpop.f32.mrf.mxu1  ;;  %3012 = vmatpush3.bf16.xpose.msra.mxu0 %v2522_v44  ;;  %v2473_v17 = vmax.bf16 %v3390_v57, %v2441_v34  ;;  %v2465_v44 = vmax.bf16 %v3390_v57, %v2433_v14 }
 0x384   : > { %v2407_v47 = vpack.c.bf16 %v3971_v45, %v3961_v36  ;;  %3340 = vmatprep.subr.msk.bf16.mxu0 %vm504_vm0, %v2476_v42  ;;  %v2440_v49 = vadd.bf16 %v3947_v26, %v2400_v38 }
 0x385   : > { %v3976_v48 = vpop.f32.mrf.mxu1  ;;  %v2510_v16 = vsel %vm504_vm0, %v2465_v44, 0 }
 0x386   : > { %v2406_v4 = vpack.c.bf16 %v3976_v48, %v3965_v39  ;;  %v2472_v61 = vmax.bf16 %v3390_v57, %v2440_v49 }
 0x387   : > { %v3982_v5 = vpop.f32.mrf.mxu1 }
 0x388   : > { %v2446_v36 = vadd.bf16 %v3947_v26, %v2406_v4 }
 0x389   : > { %v3984_v6 = vpop.f32.mrf.mxu1 }
 0x38b   : > { %v3989_v22 = vpop.f32.mrf.mxu1  ;;  %3014 = vmatpush3.bf16.xpose.msra.mxu0 %v2519_v21  ;;  %v2431_v21 = vadd.bf16 %v3947_v26, %v2391_v55  ;;  %v2430_v55 = vadd.bf16 %v3947_v26, %v2390_v15 }
 0x38c   : > { %v2409_v0 = vpack.c.bf16 %v3989_v22, %v3982_v5  ;;  %3341 = vmatprep.subr.msk.bf16.mxu0 %vm504_vm0, %v2475_v18  ;;  %v2464_v18 = vmax.bf16 %v3390_v57, %v2432_v60 }
 0x38d   : > { %v3994_v2 = vpop.f32.mrf.mxu1  ;;  %v2463_v10 = vmax.bf16 %v3390_v57, %v2431_v21  ;;  %v2462_v9 = vmax.bf16 %v3390_v57, %v2430_v55 }
 0x38e   : > { %v2408_v20 = vpack.c.bf16 %v3994_v2, %v3984_v6  ;;  %v2507_v25 = vsel %vm504_vm0, %v2464_v18, 0  ;;  %v2447_v6 = vadd.bf16 %v3947_v26, %v2407_v47 }
 0x38f   : > { %v4002_v23 = vpop.f32.mrf.mxu1  ;;  %v2504_v31 = vsel %vm504_vm0, %v2463_v10, 0  ;;  %v2501_v53 = vsel %vm504_vm0, %v2462_v9, 0 }
 0x390   : > { %v2448_v5 = vadd.bf16 %v3947_v26, %v2408_v20  ;;  %v2479_v9 = vmax.bf16 %v3390_v57, %v2447_v6 }
 0x391   : > { %v4004_v29 = vpop.f32.mrf.mxu1 }
 0x392   : > { %v2552_v47 = vsel %vm504_vm0, %v2479_v9, 0 }
 0x393   : > { %v4011_v33 = vpop.f32.mrf.mxu1  ;;  %3016 = vmatpush3.bf16.xpose.msra.mxu0 %v2516_v43 }
 0x394   : > { %3342 = vmatprep.subr.msk.bf16.mxu0 %vm504_vm0, %v2474_v46 }
 0x395   : > { %v4014_v1 = vpop.f32.mrf.mxu1 }
 0x396   : > { %v2410_v11 = vpack.c.bf16 %v4014_v1, %v4004_v29  ;;  %v2449_v29 = vadd.bf16 %v3947_v26, %v2409_v0 }
 0x397   : > { %v3321_v35 = vpop.f32.mrf.mxu1 }
 0x399   : > { %v2311_v37 = vpop.f32.mrf.mxu1 }
 0x39b   : > { %v3322_v41 = vpop.f32.mrf.mxu1  ;;  %3018 = vmatpush3.bf16.xpose.msra.mxu0 %v2513_v40 }
 0x39c   : > { %3343 = vmatprep.subr.msk.bf16.mxu0 %vm504_vm0, %v2473_v17  ;;  %v2413_v12 = vpack.c.bf16 %v3322_v41, %v3321_v35 }
 0x39d   : > { %v2314_v42 = vpop.f32.mrf.mxu1 }
 0x39e   : > { %v2453_v34 = vadd.bf16 %v3947_v26, %v2413_v12  ;;  %v2412_v38 = vpack.c.bf16 %v2314_v42, %v2311_v37  ;;  %v2411_v37 = vpack.c.bf16 %v4011_v33, %v4002_v23  ;;  %v2450_v33 = vadd.bf16 %v3947_v26, %v2410_v11 }
 0x39f   : > { %v4029_v50 = vpop.f32.mrf.mxu1 }
 0x3a0   : > { %v2485_v17 = vmax.bf16 %v3390_v57, %v2453_v34  ;;  %v2452_v41 = vadd.bf16 %v3947_v26, %v2412_v38  ;;  %v2451_v59 = vadd.bf16 %v3947_v26, %v2411_v37 }
 0x3a1   : > { %v4031_v58 = vpop.f32.mrf.mxu1 }
 0x3a2   : > { %v2484_v42 = vmax.bf16 %v3390_v57, %v2452_v41  ;;  %v2483_v10 = vmax.bf16 %v3390_v57, %v2451_v59 }
 0x3a3   : > { %v4039_v32 = vpop.f32.mrf.mxu1  ;;  %3020 = vmatpush3.bf16.xpose.msra.mxu0 %v2510_v16  ;;  %v2570_v16 = vsel %vm504_vm0, %v2485_v17, 0 }
 0x3a4   : > { %v2415_v51 = vpack.c.bf16 %v4039_v32, %v4029_v50  ;;  %3344 = vmatprep.subr.msk.bf16.mxu0 %vm504_vm0, %v2472_v61  ;;  %v2478_v32 = vmax.bf16 %v3390_v57, %v2446_v36 }
 0x3a5   : > { %v4044_v7 = vpop.f32.mrf.mxu1 }
 0x3a6   : > { %v2414_v62 = vpack.c.bf16 %v4044_v7, %v4031_v58 }
 0x3a7   : > { %v4053_v63 = vpop.f32.mrf.mxu1 }
 0x3a8   : > { %v2454_v50 = vadd.bf16 %v3947_v26, %v2414_v62 }
 0x3a9   : > { %v4055_v19 = vpop.f32.mrf.mxu1 }
 0x3aa   : > { %v2486_v45 = vmax.bf16 %v3390_v57, %v2454_v50 }
 0x3ab   : > { %v3330_v27 = vpop.f32.mrf.mxu1  ;;  %3022 = vmatpush3.bf16.xpose.msra.mxu0 %v2507_v25  ;;  %v2567_v25 = vsel %vm504_vm0, %v2484_v42, 0 }
 0x3ac   : > { %3345 = vmatprep.subr.msk.bf16.mxu0 %vm504_vm0, %v2471_v24 }
 0x3ad   : > { %v4064_v8 = vpop.f32.mrf.mxu1 }
 0x3af   : > { %v3333_v52 = vpop.f32.mrf.mxu1 }
 0x3b1   : > { %v2359_v54 = vpop.f32.mrf.mxu1 }
 0x3b3   : > { %v3334_v46 = vpop.f32.mrf.mxu1  ;;  %3024 = vmatpush3.bf16.xpose.msra.mxu0 %v2504_v31 }
 0x3b4   : > { %3346 = vmatprep.subr.msk.bf16.mxu0 %vm504_vm0, %v2470_v30  ;;  %v2419_v60 = vpack.c.bf16 %v3334_v46, %v3333_v52  ;;  %v2417_v52 = vpack.c.bf16 %v3330_v27, %v4053_v63  ;;  %v2482_v30 = vmax.bf16 %v3390_v57, %v2450_v33  ;;  %v2416_v63 = vpack.c.bf16 %v4064_v8, %v4055_v19 }
 0x3b5   : > { %v2362_v43 = vpop.f32.mrf.mxu1  ;;  %v2481_v46 = vmax.bf16 %v3390_v57, %v2449_v29  ;;  %v2480_v19 = vmax.bf16 %v3390_v57, %v2448_v5  ;;  %v2455_v8 = vadd.bf16 %v3947_v26, %v2415_v51  ;;  %v2549_v51 = vsel %vm504_vm0, %v2478_v32, 0 }
 0x3b6   : > { %v2459_v18 = vadd.bf16 %v3947_v26, %v2419_v60  ;;  %v2418_v24 = vpack.c.bf16 %v2362_v43, %v2359_v54  ;;  %v2564_v54 = vsel %vm504_vm0, %v2483_v10, 0  ;;  %v2457_v31 = vadd.bf16 %v3947_v26, %v2417_v52 }
 0x3b7   : > { %v3337_v13 = vpop.f32.mrf.mxu1  ;;  %v2561_v27 = vsel %vm504_vm0, %v2482_v30, 0  ;;  %v2456_v43 = vadd.bf16 %v3947_v26, %v2416_v63  ;;  %v2558_v0 = vsel %vm504_vm0, %v2481_v46, 0  ;;  %v2487_v2 = vmax.bf16 %v3390_v57, %v2455_v8 }
 0x3b8   : > { %v2491_v21 = vmax.bf16 %v3390_v57, %v2459_v18  ;;  %v2458_v23 = vadd.bf16 %v3947_v26, %v2418_v24  ;;  %v2489_v1 = vmax.bf16 %v3390_v57, %v2457_v31  ;;  %v2555_v20 = vsel %vm504_vm0, %v2480_v19, 0 }
 0x3b9   : > { %v2375_v3 = vpop.f32.mrf.mxu1  ;;  %v2488_v22 = vmax.bf16 %v3390_v57, %v2456_v43 }
 0x3ba   : > { %v2490_v55 = vmax.bf16 %v3390_v57, %v2458_v23 }
 0x3bb   : > { %v3338_v56 = vpop.f32.mrf.mxu1  ;;  %3026 = vmatpush3.bf16.xpose.msra.mxu0 %v2501_v53 }
 0x3bc   : > { %v2421_v15 = vpack.c.bf16 %v3338_v56, %v3337_v13 }
 0x3bd   : > { %v2378_v14 = vpop.f32.mrf.mxu1 }
 0x3be   : > { %v2461_v40 = vadd.bf16 %v3947_v26, %v2421_v15  ;;  %v2420_v44 = vpack.c.bf16 %v2378_v14, %v2375_v3 }
 0x3c0   : > { %v2493_v49 = vmax.bf16 %v3390_v57, %v2461_v40  ;;  %v2460_v35 = vadd.bf16 %v3947_v26, %v2420_v44  ;;  %v2496_v26 = vstv %s2495_s17 }
 0x3c2   : > { %v2492_v61 = vmax.bf16 %v3390_v57, %v2460_v35  ;;  %3347 = vmatprep.subr.msk.bf16.mxu1 %vm504_vm0, %v2493_v49  ;;  %3028 = vmatmul.mubr.msk.bf16.vlgmr.msra.gmra.mxu0 %vm504_vm0, %v3952_v28 }
 0x3c3   : > { %3030 = vmatpush3.bf16.xpose.msra.mxu1 %v2570_v16 }
 0x3c4   : > { %3348 = vmatprep.subr.msk.bf16.mxu1 %vm504_vm0, %v2492_v61 }
 0x3cb   : > { %3032 = vmatpush3.bf16.xpose.msra.mxu1 %v2567_v25 }
 0x3cc   : > { %3349 = vmatprep.subr.msk.bf16.mxu1 %vm504_vm0, %v2491_v21 }
 0x3d3   : > { %3034 = vmatpush3.bf16.xpose.msra.mxu1 %v2564_v54 }
 0x3d4   : > { %3350 = vmatprep.subr.msk.bf16.mxu1 %vm504_vm0, %v2490_v55 }
 0x3db   : > { %3036 = vmatpush3.bf16.xpose.msra.mxu1 %v2561_v27 }
 0x3dc   : > { %3351 = vmatprep.subr.msk.bf16.mxu1 %vm504_vm0, %v2489_v1 }
 0x3e3   : > { %3038 = vmatpush3.bf16.xpose.msra.mxu1 %v2558_v0 }
 0x3e4   : > { %3352 = vmatprep.subr.msk.bf16.mxu1 %vm504_vm0, %v2488_v22 }
 0x3eb   : > { %3040 = vmatpush3.bf16.xpose.msra.mxu1 %v2555_v20 }
 0x3ec   : > { %3353 = vmatprep.subr.msk.bf16.mxu1 %vm504_vm0, %v2487_v2 }
 0x3f3   : > { %3042 = vmatpush3.bf16.xpose.msra.mxu1 %v2552_v47 }
 0x3f4   : > { %3354 = vmatprep.subr.msk.bf16.mxu1 %vm504_vm0, %v2486_v45 }
 0x3fb   : > { %3044 = vmatpush3.bf16.xpose.msra.mxu1 %v2549_v51 }
 0x402   : > { %3046 = vmatmul.mubr.msk.bf16.vlgmr.msra.gmra.mxu1 %vm504_vm0, %v3952_v28 }
 0x482   : > { %v2630_v39 = vpop.f32.mrf.mxu0 }
 0x483   : > { %v2631_v48 = vadd.f32 %v2630_v39, %v2496_v26 }
 0x484   : > { %v2632_v57 = vpop.f32.mrf.mxu0 }
 0x485   : > { %2678 = vst [vmem:[%s389_s10] sm:$0xff] %v2631_v48  ;;  %v2633_v4 = vadd.f32 %v2632_v57, %v2496_v26 }
 0x486   : > { %v2634_v58 = vpop.f32.mrf.mxu0 }
 0x487   : > { %2679 = vst [vmem:[%s389_s10 + $0x8] sm:$0xff] %v2633_v4 }
 0x488   : > { %v2635_v7 = vpop.f32.mrf.mxu0 }
 0x4c2   : > { %v2671_v28 = vpop.f32.mrf.mxu1 }
 0x4c3   : > { %v2672_v62 = vadd.f32 %v2671_v28, %v2496_v26 }
 0x4c4   : > { %v2673_v12 = vpop.f32.mrf.mxu1 }
 0x4c5   : > { %2680 = vst [vmem:[%s389_s10 + $0x10] sm:$0xff] %v2672_v62  ;;  %v2674_v13 = vadd.f32 %v2673_v12, %v2496_v26 }
 0x4c6   : > { %v2675_v3 = vpop.f32.mrf.mxu1 }
 0x4c7   : > { %2681 = vst [vmem:[%s389_s10 + $0x18] sm:$0xff] %v2674_v13 }
 0x4c8   : > { %v2676_v34 = vpop.f32.mrf.mxu1 }
 0x4c9 PF: > { %s22_s19 = sadd.s32 1, %s3388_s19  }
 0x4ca   : > { %p19_p5 = scmp.ge.s32.totalorder %s22_s19, 4  }
 0x4cc   :  { %21 = sbr.rel (!%p19_p5) target bundleno = 2 (0x2), region = 94 }

</bundles_post_ra>
